<compile_context>
chip_gen: v7x
topology: tpu7x:2x2x1
jax: 0.10.0
libtpu: 0.0.40
codegen_flags: <defaults>
</compile_context>

<pallas_src>
import functools
import math

import jax
import jax.numpy as jnp
from jax import lax
from jax.experimental import pallas as pl
from jax.experimental.pallas import tpu as pltpu

K = 3          # depthwise conv kernel size
PAD = K // 2   # "same" padding
_INV_SQRT2 = 1.0 / math.sqrt(2.0)


def _residual_kernel(x_ref, top_ref, bot_ref, w_ref, b_ref, scale_ref,
                     shift_ref, o_ref, *, W):
    h = pl.program_id(2)
    nh = pl.num_programs(2)

    xs = x_ref[0].astype(jnp.float32)                     # (H_t, W, Cb)
    h_t, _, cb = xs.shape

    # 1-row halos above/below the strip; zeroed at the true image boundary.
    top = top_ref[0].astype(jnp.float32)                  # (1, W, Cb)
    bot = bot_ref[0].astype(jnp.float32)                  # (1, W, Cb)
    top = jnp.where(h == 0, 0.0, top)
    bot = jnp.where(h == nh - 1, 0.0, bot)

    # Pad along H only (leading axis -> whole (W, C) slabs, no relayout).
    xp = jnp.concatenate([top, xs, bot], axis=0)          # (H_t + 2, W, Cb)

    # W-direction neighbour planes via XLU rotate + boundary mask
    # (replaces sublane-misaligned slices of a W-padded buffer).
    col = lax.broadcasted_iota(jnp.int32, (W, cb), 0)     # sublane (W) index
    not_first = (col != 0).astype(jnp.float32)[None]      # (1, W, Cb)
    not_last = (col != W - 1).astype(jnp.float32)[None]
    plane_l = pltpu.roll(xp, shift=1, axis=1) * not_first      # x[.., j-1, :]
    plane_r = pltpu.roll(xp, shift=W - 1, axis=1) * not_last   # x[.., j+1, :]
    planes = (plane_l, xp, plane_r)                       # dj = 0, 1, 2

    # Depthwise 3x3 conv: 3 hoisted W-planes x 3 H offsets, per-lane taps.
    wm = w_ref[...].astype(jnp.float32)                   # (K*K, Cb)
    acc = None
    for dj in range(K):
        p = planes[dj]
        for di in range(K):
            term = p[di:di + h_t] * wm[di * K + dj][None, None, :]
            acc = term if acc is None else acc + term
    acc = acc + b_ref[0][None, None, :]                   # conv bias

    # Exact erf-GELU (PyTorch nn.GELU default, approximate='none').
    g = 0.5 * acc * (1.0 + lax.erf(acc * _INV_SQRT2))
    # TODO(synk): optionally use tanh-approx GELU (EUP slot) on v7x when
    # bit-matching PyTorch's exact GELU is not required.

    # Eval-mode BatchNorm2d folded to per-channel affine, then residual add
    # from the SAME tile (no second HBM read of x).
    out = g * scale_ref[0][None, None, :] + shift_ref[0][None, None, :] + xs
    o_ref[0] = out.astype(o_ref.dtype)


def _vmem_limit_bytes():
    cap = 64 * 1024 * 1024
    try:
        cap = int(getattr(pltpu.get_tpu_info(), "vmem_capacity_bytes", cap))
    except Exception:
        pass
    # ~80% of physical VMEM, capped: ~51 MiB on v7x (64 MiB/TC), ~102 MiB on
    # v5e/v6e (128 MiB).
    return max(32 * 1024 * 1024, min(int(cap * 0.8), 112 * 1024 * 1024))


def _choose_tiles(N, H, W, C, itemsize, vmem_limit):
    # Channel (lane) block: lane-dense 128/256 when divisible, else full C.
    # TODO(synk): pad C to a multiple of 128 (or fold spatial into lanes for
    # tiny C) so ragged channel counts keep output stores unmasked.
    c_blk = C
    if C > 128:
        if C % 256 == 0 and vmem_limit >= 96 * 1024 * 1024:
            c_blk = 256
        elif C % 128 == 0:
            c_blk = 128
    n_cblk = C // c_blk

    # H strip: largest divisor of H whose f32 strip stays within a per-step
    # byte budget (keeps the full pipeline well inside v7x's 64 MiB VMEM
    # while staying big enough to amortize per-grid-step overhead).
    budget = max(512 * 1024, min(vmem_limit // 24, 8 * 1024 * 1024))
    h_t = H
    if H * W * c_blk * itemsize > budget:
        h_t = 1
        for cand in range(H, 0, -1):
            if H % cand == 0 and cand * W * c_blk * itemsize <= budget:
                h_t = cand
                break

    # Guarantee >= 2 parallel grid steps (v7x has 2 TensorCores per chip).
    if N * n_cblk * (H // h_t) < 2:
        for cand in range(h_t // 2, 0, -1):
            if H % cand == 0:
                h_t = cand
                break
    return c_blk, h_t


def residual_convmixer_nhwc(x, w, b, scale, shift):
    """Fused ConvMixer residual block, channels-last (NHWC) end-to-end.

    x:     (N, H, W, C) activations (f32 or bf16).
    w:     (C, K*K) depthwise conv taps (PyTorch weight[c, 0].reshape(-1)).
    b:     (C,) conv bias.
    scale, shift: (C,) eval-mode BatchNorm folded to y = scale*x + shift.
    """
    N, H, W, C = x.shape
    vmem_limit = _vmem_limit_bytes()
    c_blk, h_t = _choose_tiles(N, H, W, C, x.dtype.itemsize, vmem_limit)
    grid = (N, C // c_blk, H // h_t)

    # Per-channel parameters with channels in the lane dimension.
    w_t = jnp.transpose(w, (1, 0)).astype(jnp.float32)    # (K*K, C)
    b2 = b.reshape(1, C).astype(jnp.float32)
    s2 = scale.reshape(1, C).astype(jnp.float32)
    t2 = shift.reshape(1, C).astype(jnp.float32)

    strip_spec = pl.BlockSpec((1, h_t, W, c_blk), lambda n, c, h: (n, h, 0, c))
    # 1-row halo blocks above/below the strip.  Block size 1 along H, so the
    # index_map returns a row index; clamped at the image boundary (the kernel
    # zeroes the clamped row, reproducing "same" padding).
    top_spec = pl.BlockSpec(
        (1, 1, W, c_blk),
        lambda n, c, h: (n, jnp.maximum(h * h_t - 1, 0), 0, c))
    bot_spec = pl.BlockSpec(
        (1, 1, W, c_blk),
        lambda n, c, h: (n, jnp.minimum((h + 1) * h_t, H - 1), 0, c))
    w_spec = pl.BlockSpec((K * K, c_blk), lambda n, c, h: (0, c))
    p_spec = pl.BlockSpec((1, c_blk), lambda n, c, h: (0, c))

    kernel = functools.partial(_residual_kernel, W=W)
    return pl.pallas_call(
        kernel,
        out_shape=jax.ShapeDtypeStruct((N, H, W, C), x.dtype),
        grid=grid,
        in_specs=[strip_spec, top_spec, bot_spec, w_spec, p_spec, p_spec,
                  p_spec],
        out_specs=strip_spec,
        compiler_params=pltpu.CompilerParams(
            dimension_semantics=("parallel", "parallel", "parallel"),
            vmem_limit_bytes=vmem_limit),
    )(x, x, x, w_t, b2, s2, t2)


def _reference_nhwc(x, w, b, scale, shift):
    """Pure-JAX reference of the same residual block (NHWC)."""
    N, H, W, C = x.shape
    wk = jnp.transpose(w.reshape(C, K, K), (1, 2, 0)).reshape(K, K, 1, C)
    conv = lax.conv_general_dilated(
        x, wk, window_strides=(1, 1), padding="SAME",
        dimension_numbers=("NHWC", "HWIO", "NHWC"),
        feature_group_count=C)
    conv = conv + b[None, None, None, :]
    g = 0.5 * conv * (1.0 + lax.erf(conv * _INV_SQRT2))
    bn = g * scale[None, None, None, :] + shift[None, None, None, :]
    return bn + x


if __name__ == "__main__":
    # NHWC (2, 16, 16, 4)  ==  NCHW (2, 4, 16, 16) in the PyTorch module.
    N, H, W, C = 2, 16, 16, 4

    key = jax.random.PRNGKey(0)
    kx, kw, kb, kg, kbeta = jax.random.split(key, 5)

    x = jax.random.normal(kx, (N, H, W, C), dtype=jnp.float32)

    # Deterministic synthetic parameters.
    w = jax.random.normal(kw, (C, K * K), dtype=jnp.float32) * 0.1   # dw taps
    b = jax.random.normal(kb, (C,), dtype=jnp.float32) * 0.1         # conv bias
    gamma = 1.0 + 0.1 * jax.random.normal(kg, (C,), dtype=jnp.float32)
    beta = 0.1 * jax.random.normal(kbeta, (C,), dtype=jnp.float32)
    running_mean = jnp.zeros((C,), jnp.float32)
    running_var = jnp.ones((C,), jnp.float32)
    eps = 1e-5
    # Fold BatchNorm2d (eval mode) into per-channel scale/shift.
    scale = gamma / jnp.sqrt(running_var + eps)
    shift = beta - running_mean * scale

    out = jax.block_until_ready(residual_convmixer_nhwc(x, w, b, scale, shift))
    ref = _reference_nhwc(x, w, b, scale, shift)

    assert out.shape == (N, H, W, C) and out.dtype == jnp.float32
    assert jnp.allclose(out, ref, rtol=1e-4, atol=1e-4)

    print("KERNEL_OK")
</pallas_src>

<mosaic_0001>
module attributes {stable_mosaic.version = 11 : i64} {
  func.func @_residual_kernel(%arg0: i32, %arg1: i32, %arg2: i32, %arg3: memref<1x16x16x4xf32, #tpu.memory_space<vmem>>, %arg4: memref<1x1x16x4xf32, #tpu.memory_space<vmem>>, %arg5: memref<1x1x16x4xf32, #tpu.memory_space<vmem>>, %arg6: memref<9x4xf32, #tpu.memory_space<vmem>>, %arg7: memref<1x4xf32, #tpu.memory_space<vmem>>, %arg8: memref<1x4xf32, #tpu.memory_space<vmem>>, %arg9: memref<1x4xf32, #tpu.memory_space<vmem>>, %arg10: memref<1x16x16x4xf32, #tpu.memory_space<vmem>>) attributes {dimension_semantics = [#tpu.dimension_semantics<parallel>, #tpu.dimension_semantics<parallel>, #tpu.dimension_semantics<parallel>], iteration_bounds = array<i64: 2, 1, 1>, scalar_prefetch = 0 : i64, scratch_operands = 0 : i64, tpu.core_type = #tpu.core_type<tc>, window_params = [{transform_indices = @transform_0, window_bounds = array<i64: 1, 16, 16, 4>}, {transform_indices = @transform_1, window_bounds = array<i64: 1, 1, 16, 4>}, {transform_indices = @transform_2, window_bounds = array<i64: 1, 1, 16, 4>}, {transform_indices = @transform_3, window_bounds = array<i64: 9, 4>}, {transform_indices = @transform_4, window_bounds = array<i64: 1, 4>}, {transform_indices = @transform_5, window_bounds = array<i64: 1, 4>}, {transform_indices = @transform_6, window_bounds = array<i64: 1, 4>}, {transform_indices = @transform_7, window_bounds = array<i64: 1, 16, 16, 4>}]} {
    %c0 = arith.constant 0 : index
    %c0_0 = arith.constant 0 : index
    %c0_1 = arith.constant 0 : index
    %c0_2 = arith.constant 0 : index
    %0 = vector.load %arg3[%c0, %c0_0, %c0_1, %c0_2] : memref<1x16x16x4xf32, #tpu.memory_space<vmem>>, vector<1x16x16x4xf32>
    %1 = vector.shape_cast %0 : vector<1x16x16x4xf32> to vector<16x16x4xf32>
    %c0_3 = arith.constant 0 : index
    %c0_4 = arith.constant 0 : index
    %c0_5 = arith.constant 0 : index
    %c0_6 = arith.constant 0 : index
    %2 = vector.load %arg4[%c0_3, %c0_4, %c0_5, %c0_6] : memref<1x1x16x4xf32, #tpu.memory_space<vmem>>, vector<1x1x16x4xf32>
    %3 = vector.shape_cast %2 : vector<1x1x16x4xf32> to vector<1x16x4xf32>
    %c0_7 = arith.constant 0 : index
    %c0_8 = arith.constant 0 : index
    %c0_9 = arith.constant 0 : index
    %c0_10 = arith.constant 0 : index
    %4 = vector.load %arg5[%c0_7, %c0_8, %c0_9, %c0_10] : memref<1x1x16x4xf32, #tpu.memory_space<vmem>>, vector<1x1x16x4xf32>
    %5 = vector.shape_cast %4 : vector<1x1x16x4xf32> to vector<1x16x4xf32>
    %c0_i32 = arith.constant 0 : i32
    %6 = arith.cmpi eq, %arg2, %c0_i32 : i32
    %cst = arith.constant 0.000000e+00 : f32
    %7 = vector.broadcast %cst : f32 to vector<1x16x4xf32>
    %8 = arith.select %6, %7, %3 : vector<1x16x4xf32>
    %c0_i32_11 = arith.constant 0 : i32
    %9 = arith.cmpi eq, %arg2, %c0_i32_11 : i32
    %cst_12 = arith.constant 0.000000e+00 : f32
    %10 = vector.broadcast %cst_12 : f32 to vector<1x16x4xf32>
    %11 = arith.select %9, %10, %5 : vector<1x16x4xf32>
    %12 = tpu.concatenate %8, %1, %11 in 0 : vector<1x16x4xf32>, vector<16x16x4xf32>, vector<1x16x4xf32> -> vector<18x16x4xf32>
    %13 = tpu.iota {dimensions = array<i32: 0>} : vector<16x4xi32>
    %c0_i32_13 = arith.constant 0 : i32
    %14 = vector.broadcast %c0_i32_13 : i32 to vector<16x4xi32>
    %15 = arith.cmpi ne, %13, %14 : vector<16x4xi32>
    %16 = arith.extui %15 : vector<16x4xi1> to vector<16x4xi32>
    %17 = arith.sitofp %16 : vector<16x4xi32> to vector<16x4xf32>
    %18 = vector.shape_cast %17 : vector<16x4xf32> to vector<1x16x4xf32>
    %c15_i32 = arith.constant 15 : i32
    %19 = vector.broadcast %c15_i32 : i32 to vector<16x4xi32>
    %20 = arith.cmpi ne, %13, %19 : vector<16x4xi32>
    %21 = arith.extui %20 : vector<16x4xi1> to vector<16x4xi32>
    %22 = arith.sitofp %21 : vector<16x4xi32> to vector<16x4xf32>
    %23 = vector.shape_cast %22 : vector<16x4xf32> to vector<1x16x4xf32>
    %c1_i32 = arith.constant 1 : i32
    %24 = tpu.dynamic_rotate %12 by %c1_i32 dim 1 : vector<18x16x4xf32>, i32 -> vector<18x16x4xf32>
    %25 = vector.broadcast %18 : vector<1x16x4xf32> to vector<18x16x4xf32>
    %26 = arith.mulf %24, %25 : vector<18x16x4xf32>
    %c15_i32_14 = arith.constant 15 : i32
    %27 = tpu.dynamic_rotate %12 by %c15_i32_14 dim 1 : vector<18x16x4xf32>, i32 -> vector<18x16x4xf32>
    %28 = vector.broadcast %23 : vector<1x16x4xf32> to vector<18x16x4xf32>
    %29 = arith.mulf %27, %28 : vector<18x16x4xf32>
    %c0_15 = arith.constant 0 : index
    %c0_16 = arith.constant 0 : index
    %30 = vector.load %arg6[%c0_15, %c0_16] : memref<9x4xf32, #tpu.memory_space<vmem>>, vector<9x4xf32>
    %31 = vector.extract_strided_slice %26 {offsets = [0, 0, 0], sizes = [16, 16, 4], strides = [1, 1, 1]} : vector<18x16x4xf32> to vector<16x16x4xf32>
    %32 = vector.extract_strided_slice %30 {offsets = [0, 0], sizes = [1, 4], strides = [1, 1]} : vector<9x4xf32> to vector<1x4xf32>
    %33 = vector.shape_cast %32 : vector<1x4xf32> to vector<4xf32>
    %34 = vector.shape_cast %33 : vector<4xf32> to vector<1x1x4xf32>
    %35 = vector.broadcast %34 : vector<1x1x4xf32> to vector<16x16x4xf32>
    %36 = arith.mulf %31, %35 : vector<16x16x4xf32>
    %37 = vector.extract_strided_slice %26 {offsets = [1, 0, 0], sizes = [16, 16, 4], strides = [1, 1, 1]} : vector<18x16x4xf32> to vector<16x16x4xf32>
    %38 = vector.extract_strided_slice %30 {offsets = [3, 0], sizes = [1, 4], strides = [1, 1]} : vector<9x4xf32> to vector<1x4xf32>
    %39 = vector.shape_cast %38 : vector<1x4xf32> to vector<4xf32>
    %40 = vector.shape_cast %39 : vector<4xf32> to vector<1x1x4xf32>
    %41 = vector.broadcast %40 : vector<1x1x4xf32> to vector<16x16x4xf32>
    %42 = arith.mulf %37, %41 : vector<16x16x4xf32>
    %43 = arith.addf %36, %42 : vector<16x16x4xf32>
    %44 = vector.extract_strided_slice %26 {offsets = [2, 0, 0], sizes = [16, 16, 4], strides = [1, 1, 1]} : vector<18x16x4xf32> to vector<16x16x4xf32>
    %45 = vector.extract_strided_slice %30 {offsets = [6, 0], sizes = [1, 4], strides = [1, 1]} : vector<9x4xf32> to vector<1x4xf32>
    %46 = vector.shape_cast %45 : vector<1x4xf32> to vector<4xf32>
    %47 = vector.shape_cast %46 : vector<4xf32> to vector<1x1x4xf32>
    %48 = vector.broadcast %47 : vector<1x1x4xf32> to vector<16x16x4xf32>
    %49 = arith.mulf %44, %48 : vector<16x16x4xf32>
    %50 = arith.addf %43, %49 : vector<16x16x4xf32>
    %51 = vector.extract_strided_slice %12 {offsets = [0, 0, 0], sizes = [16, 16, 4], strides = [1, 1, 1]} : vector<18x16x4xf32> to vector<16x16x4xf32>
    %52 = vector.extract_strided_slice %30 {offsets = [1, 0], sizes = [1, 4], strides = [1, 1]} : vector<9x4xf32> to vector<1x4xf32>
    %53 = vector.shape_cast %52 : vector<1x4xf32> to vector<4xf32>
    %54 = vector.shape_cast %53 : vector<4xf32> to vector<1x1x4xf32>
    %55 = vector.broadcast %54 : vector<1x1x4xf32> to vector<16x16x4xf32>
    %56 = arith.mulf %51, %55 : vector<16x16x4xf32>
    %57 = arith.addf %50, %56 : vector<16x16x4xf32>
    %58 = vector.extract_strided_slice %12 {offsets = [1, 0, 0], sizes = [16, 16, 4], strides = [1, 1, 1]} : vector<18x16x4xf32> to vector<16x16x4xf32>
    %59 = vector.extract_strided_slice %30 {offsets = [4, 0], sizes = [1, 4], strides = [1, 1]} : vector<9x4xf32> to vector<1x4xf32>
    %60 = vector.shape_cast %59 : vector<1x4xf32> to vector<4xf32>
    %61 = vector.shape_cast %60 : vector<4xf32> to vector<1x1x4xf32>
    %62 = vector.broadcast %61 : vector<1x1x4xf32> to vector<16x16x4xf32>
    %63 = arith.mulf %58, %62 : vector<16x16x4xf32>
    %64 = arith.addf %57, %63 : vector<16x16x4xf32>
    %65 = vector.extract_strided_slice %12 {offsets = [2, 0, 0], sizes = [16, 16, 4], strides = [1, 1, 1]} : vector<18x16x4xf32> to vector<16x16x4xf32>
    %66 = vector.extract_strided_slice %30 {offsets = [7, 0], sizes = [1, 4], strides = [1, 1]} : vector<9x4xf32> to vector<1x4xf32>
    %67 = vector.shape_cast %66 : vector<1x4xf32> to vector<4xf32>
    %68 = vector.shape_cast %67 : vector<4xf32> to vector<1x1x4xf32>
    %69 = vector.broadcast %68 : vector<1x1x4xf32> to vector<16x16x4xf32>
    %70 = arith.mulf %65, %69 : vector<16x16x4xf32>
    %71 = arith.addf %64, %70 : vector<16x16x4xf32>
    %72 = vector.extract_strided_slice %29 {offsets = [0, 0, 0], sizes = [16, 16, 4], strides = [1, 1, 1]} : vector<18x16x4xf32> to vector<16x16x4xf32>
    %73 = vector.extract_strided_slice %30 {offsets = [2, 0], sizes = [1, 4], strides = [1, 1]} : vector<9x4xf32> to vector<1x4xf32>
    %74 = vector.shape_cast %73 : vector<1x4xf32> to vector<4xf32>
    %75 = vector.shape_cast %74 : vector<4xf32> to vector<1x1x4xf32>
    %76 = vector.broadcast %75 : vector<1x1x4xf32> to vector<16x16x4xf32>
    %77 = arith.mulf %72, %76 : vector<16x16x4xf32>
    %78 = arith.addf %71, %77 : vector<16x16x4xf32>
    %79 = vector.extract_strided_slice %29 {offsets = [1, 0, 0], sizes = [16, 16, 4], strides = [1, 1, 1]} : vector<18x16x4xf32> to vector<16x16x4xf32>
    %80 = vector.extract_strided_slice %30 {offsets = [5, 0], sizes = [1, 4], strides = [1, 1]} : vector<9x4xf32> to vector<1x4xf32>
    %81 = vector.shape_cast %80 : vector<1x4xf32> to vector<4xf32>
    %82 = vector.shape_cast %81 : vector<4xf32> to vector<1x1x4xf32>
    %83 = vector.broadcast %82 : vector<1x1x4xf32> to vector<16x16x4xf32>
    %84 = arith.mulf %79, %83 : vector<16x16x4xf32>
    %85 = arith.addf %78, %84 : vector<16x16x4xf32>
    %86 = vector.extract_strided_slice %29 {offsets = [2, 0, 0], sizes = [16, 16, 4], strides = [1, 1, 1]} : vector<18x16x4xf32> to vector<16x16x4xf32>
    %87 = vector.extract_strided_slice %30 {offsets = [8, 0], sizes = [1, 4], strides = [1, 1]} : vector<9x4xf32> to vector<1x4xf32>
    %88 = vector.shape_cast %87 : vector<1x4xf32> to vector<4xf32>
    %89 = vector.shape_cast %88 : vector<4xf32> to vector<1x1x4xf32>
    %90 = vector.broadcast %89 : vector<1x1x4xf32> to vector<16x16x4xf32>
    %91 = arith.mulf %86, %90 : vector<16x16x4xf32>
    %92 = arith.addf %85, %91 : vector<16x16x4xf32>
    %c0_17 = arith.constant 0 : index
    %c0_18 = arith.constant 0 : index
    %93 = vector.load %arg7[%c0_17, %c0_18] : memref<1x4xf32, #tpu.memory_space<vmem>>, vector<1x4xf32>
    %94 = vector.shape_cast %93 : vector<1x4xf32> to vector<4xf32>
    %95 = vector.shape_cast %94 : vector<4xf32> to vector<1x1x4xf32>
    %96 = vector.broadcast %95 : vector<1x1x4xf32> to vector<16x16x4xf32>
    %97 = arith.addf %92, %96 : vector<16x16x4xf32>
    %cst_19 = arith.constant 5.000000e-01 : f32
    %98 = vector.broadcast %cst_19 : f32 to vector<16x16x4xf32>
    %99 = arith.mulf %98, %97 : vector<16x16x4xf32>
    %cst_20 = arith.constant 0.707106769 : f32
    %100 = vector.broadcast %cst_20 : f32 to vector<16x16x4xf32>
    %101 = arith.mulf %97, %100 : vector<16x16x4xf32>
    %102 = math.erf %101 : vector<16x16x4xf32>
    %cst_21 = arith.constant 1.000000e+00 : f32
    %103 = vector.broadcast %cst_21 : f32 to vector<16x16x4xf32>
    %104 = arith.addf %103, %102 : vector<16x16x4xf32>
    %105 = arith.mulf %99, %104 : vector<16x16x4xf32>
    %c0_22 = arith.constant 0 : index
    %c0_23 = arith.constant 0 : index
    %106 = vector.load %arg8[%c0_22, %c0_23] : memref<1x4xf32, #tpu.memory_space<vmem>>, vector<1x4xf32>
    %107 = vector.shape_cast %106 : vector<1x4xf32> to vector<4xf32>
    %108 = vector.shape_cast %107 : vector<4xf32> to vector<1x1x4xf32>
    %109 = vector.broadcast %108 : vector<1x1x4xf32> to vector<16x16x4xf32>
    %110 = arith.mulf %105, %109 : vector<16x16x4xf32>
    %c0_24 = arith.constant 0 : index
    %c0_25 = arith.constant 0 : index
    %111 = vector.load %arg9[%c0_24, %c0_25] : memref<1x4xf32, #tpu.memory_space<vmem>>, vector<1x4xf32>
    %112 = vector.shape_cast %111 : vector<1x4xf32> to vector<4xf32>
    %113 = vector.shape_cast %112 : vector<4xf32> to vector<1x1x4xf32>
    %114 = vector.broadcast %113 : vector<1x1x4xf32> to vector<16x16x4xf32>
    %115 = arith.addf %110, %114 : vector<16x16x4xf32>
    %116 = arith.addf %115, %1 : vector<16x16x4xf32>
    %c0_26 = arith.constant 0 : index
    %c0_27 = arith.constant 0 : index
    %c0_28 = arith.constant 0 : index
    %c0_29 = arith.constant 0 : index
    %117 = vector.load %arg10[%c0_26, %c0_27, %c0_28, %c0_29] : memref<1x16x16x4xf32, #tpu.memory_space<vmem>>, vector<1x16x16x4xf32>
    %118 = vector.shape_cast %117 : vector<1x16x16x4xf32> to vector<16x16x4xf32>
    %119 = vector.shape_cast %116 : vector<16x16x4xf32> to vector<1x16x16x4xf32>
    tpu.vector_store %arg10[%c0_26, %c0_27, %c0_28, %c0_29], %119 {strides = array<i32>} : memref<1x16x16x4xf32, #tpu.memory_space<vmem>>, vector<1x16x16x4xf32>,
    return
  }
  func.func @transform_0(%arg0: i32, %arg1: i32, %arg2: i32) -> (i32, i32, i32, i32) {
    %c0_i32 = arith.constant 0 : i32
    %c0_i32_0 = arith.constant 0 : i32
    return %arg0, %arg2, %c0_i32, %arg1 : i32, i32, i32, i32
  }
  func.func @transform_1(%arg0: i32, %arg1: i32, %arg2: i32) -> (i32, i32, i32, i32) {
    %c16_i32 = arith.constant 16 : i32
    %0 = arith.muli %arg2, %c16_i32 : i32
    %c1_i32 = arith.constant 1 : i32
    %1 = arith.subi %0, %c1_i32 : i32
    %c0_i32 = arith.constant 0 : i32
    %2 = arith.maxsi %1, %c0_i32 : i32
    %c0_i32_0 = arith.constant 0 : i32
    %c0_i32_1 = arith.constant 0 : i32
    return %arg0, %2, %c0_i32_0, %arg1 : i32, i32, i32, i32
  }
  func.func @transform_2(%arg0: i32, %arg1: i32, %arg2: i32) -> (i32, i32, i32, i32) {
    %c1_i32 = arith.constant 1 : i32
    %0 = arith.addi %arg2, %c1_i32 : i32
    %c16_i32 = arith.constant 16 : i32
    %1 = arith.muli %0, %c16_i32 : i32
    %c15_i32 = arith.constant 15 : i32
    %2 = arith.minsi %1, %c15_i32 : i32
    %c0_i32 = arith.constant 0 : i32
    %c0_i32_0 = arith.constant 0 : i32
    return %arg0, %2, %c0_i32, %arg1 : i32, i32, i32, i32
  }
  func.func @transform_3(%arg0: i32, %arg1: i32, %arg2: i32) -> (i32, i32) {
    %c0_i32 = arith.constant 0 : i32
    %c0_i32_0 = arith.constant 0 : i32
    return %c0_i32, %arg1 : i32, i32
  }
  func.func @transform_4(%arg0: i32, %arg1: i32, %arg2: i32) -> (i32, i32) {
    %c0_i32 = arith.constant 0 : i32
    %c0_i32_0 = arith.constant 0 : i32
    return %c0_i32, %arg1 : i32, i32
  }
  func.func @transform_5(%arg0: i32, %arg1: i32, %arg2: i32) -> (i32, i32) {
    %c0_i32 = arith.constant 0 : i32
    %c0_i32_0 = arith.constant 0 : i32
    return %c0_i32, %arg1 : i32, i32
  }
  func.func @transform_6(%arg0: i32, %arg1: i32, %arg2: i32) -> (i32, i32) {
    %c0_i32 = arith.constant 0 : i32
    %c0_i32_0 = arith.constant 0 : i32
    return %c0_i32, %arg1 : i32, i32
  }
  func.func @transform_7(%arg0: i32, %arg1: i32, %arg2: i32) -> (i32, i32, i32, i32) {
    %c0_i32 = arith.constant 0 : i32
    %c0_i32_0 = arith.constant 0 : i32
    return %arg0, %arg2, %c0_i32, %arg1 : i32, i32, i32, i32
  }
}

</mosaic_0001>

<bundles_post_ra>
// kernel: tpu_custom_call.1
= control target key start
LH: loop header
LB: loop body
LE: loop exit
PB: predicated region body
PF: predicated region fallthrough
CT: control target
= control target key end

     0   :  { %s2154_s24 = smov 0   ;;  %s2156_s1 = smov 0   ;;  %s3494_s0 = inlined_call_operand.vmem [shape: f32[2,16,16,4], index: 0, kind: input, shape index: {}]   ;;  %s3495_s1 = inlined_call_operand.vmem [shape: f32[2,16,16,4], index: 1, kind: input, shape index: {}]   ;;  %s3496_s2 = inlined_call_operand.vmem [shape: f32[2,16,16,4], index: 2, kind: input, shape index: {}]   ;;  %s3497_s3 = inlined_call_operand.vmem [shape: f32[9,4], index: 3, kind: input, shape index: {}]   ;;  %s3498_s4 = inlined_call_operand.vmem [shape: f32[1,4], index: 4, kind: input, shape index: {}]   ;;  %s3499_s5 = inlined_call_operand.vmem [shape: f32[1,4], index: 5, kind: input, shape index: {}]   ;;  %s3500_s6 = inlined_call_operand.vmem [shape: f32[1,4], index: 6, kind: input, shape index: {}]   ;;  %s3501_s7 = inlined_call_operand.vmem [shape: f32[2,16,16,4], index: 7, kind: output, shape index: {}]  }
   0x1   :  { %s2158_s2 = smov 0  }
   0x2 LB: > { %s36_s25 = sadd.s32 1, %s2107_s1  ;;  %p1974_p0 = scmp.ge.s32.totalorder %s2111_s2, 1  ;;  %s2111_s2 = sphi %s2158_s2, %s17_s2   ;;  %s2107_s1 = sphi %s2156_s1, %s3522_s1   ;;  %s2103_s24 = sphi %s2154_s24, %s3521_s24  }
   0x3   : > { %p38_p1 = scmp.ge.s32.totalorder %s36_s25, 2  ;;  %p380_p2 = scmp.lt.s32.totalorder %s2111_s2, 3 }
   0x5   : > { %s3524_s25 = smov (%p38_p1, %s36_s25), 0  ;;  %p381_p3 = pnand %p1974_p0, %p380_p2 }
   0x7   : > { %384 = sbr.rel (%p381_p3) target bundleno = 297 (0x129), region = 48 }
   0xe   : > { %p474_p4 = scmp.lt.s32.totalorder %s2103_s24, 1  ;;  %v598_v0 = vlaneseq  ;;  %v2113_v2 = vmov 0.0   ;;  %v2197_v7 = vld [vmem:[%s3497_s3] sm:$0xff]  ;;  %vm1722_vm4 = vcmask 31744  }
   0xf   : > { %v2176_v3 = vrot.slane %v2113_v2, 7  ;;  %v2181_v5 = vrot.slane %v2113_v2, 1 }
  0x10   : > { %s3526_s24 = smov (!%p474_p4, %s2103_s24), 1  ;;  %v2174_v1 = vshrl.u32 %v598_v0, 7 }
  0x11   : > { %3509 = vst [vmem:[#allocation2_spill] sm:$0xff] %v2176_v3  ;;  %s1991_s26 = sshll.u32 %s3526_s24, 8  ;;  %3510 = vst [vmem:[#allocation3_spill] sm:$0xff] %v2181_v5 }
  0x12   : > { %v600_v4 = vadd.s32 8, %v2174_v1  ;;  %vm601_vm0 = vcmp.ne.s32.totalorder %v2174_v1, 0  ;;  %s2188_s29 = scalar_lea.vmem %s3494_s0, %s1991_s26  ;;  %vm649_vm1 = vcmp.lt.s32.totalorder %v2174_v1, 1  ;;  %vm758_vm2 = vcmp.lt.s32.totalorder %v2174_v1, 7  ;;  %s2519_s19 = scalar_lea.vmem %s3501_s7, %s1991_s26 }
  0x13   : > { %v2190_v6 = vsel %vm601_vm0, 1.0, %v2113_v2  ;;  %v835_v8 = vsub.s32 0, %v2174_v1  ;;  %v2201_v9 = vld [vmem:[%s2188_s29] sm:$0xff]  ;;  %v2204_v10 = vld [vmem:[%s2188_s29 + $0x8] sm:$0xff]  ;;  %v2207_v11 = vld [vmem:[%s2188_s29 + $0x10] sm:$0xff]  ;;  %v871_v12 = vsub.s32 3, %v2174_v1 }
  0x14   : > { %3511 = vst [vmem:[#allocation4_spill] sm:$0xff] %v2190_v6  ;;  %vm608_vm3 = vcmp.ne.s32.totalorder %v600_v4, 15  ;;  %v939_v13 = vsub.s32 6, %v2174_v1  ;;  %v2212_v14 = vld [vmem:[%s2188_s29 + $0x18] sm:$0xff]  ;;  %v2215_v15 = vld [vmem:[%s2188_s29 + $0x20] sm:$0xff]  ;;  %v2218_v16 = vld [vmem:[%s2188_s29 + $0x28] sm:$0xff]  ;;  %v2224_v19 = vmul.f32 %v2190_v6, %v2176_v3 }
  0x15   : > { %3512 = vst [vmem:[#allocation5_spill] sm:$0xff] %v2215_v15  ;;  %v614_v17 = vrot.slane %v2201_v9, 7  ;;  %v615_v18 = vrot.slane %v2207_v11, 7  ;;  %v1007_v20 = vsub.s32 1, %v2174_v1  ;;  %v616_v21 = vrot.slane %v2215_v15, 7 }
  0x16   : > { %3513 = vst [vmem:[#allocation6_spill] sm:$0xff] %v2224_v19  ;;  %v632_v22 = vrot.slane %v2204_v10, 7  ;;  %v633_v23 = vrot.slane %v2212_v14, 7  ;;  %v634_v24 = vrot.slane %v2218_v16, 7  ;;  %v2231_v25 = vsel %vm608_vm3, 1.0, %v2113_v2 }
  0x17   : > { %v723_v26 = vrot.slane %v2201_v9, 1  ;;  %v2235_v27 = vrot.slane %v2197_v7, %v835_v8  ;;  %v1075_v28 = vsub.s32 4, %v2174_v1  ;;  %v724_v30 = vrot.slane %v2207_v11, 1 }
  0x18   : > { %v669_v29 = vsel %vm649_vm1, %v632_v22, %v614_v17  ;;  %v741_v31 = vrot.slane %v2204_v10, 1  ;;  %v742_v32 = vrot.slane %v2212_v14, 1  ;;  %v651_v33 = vsel %vm649_vm1, %v614_v17, %v632_v22 }
  0x19   : > { %v670_v34 = vsel %vm649_vm1, %v633_v23, %v615_v18  ;;  %v671_v35 = vsel %vm649_vm1, %v634_v24, %v616_v21  ;;  %v688_v36 = vmul.f32 %v2190_v6, %v669_v29  ;;  %v652_v37 = vsel %vm649_vm1, %v615_v18, %v633_v23 }
  0x1a   : > { %v2254_v38 = vsel %vm649_vm1, %v616_v21, %v634_v24  ;;  %v2257_v39 = vmul.f32 %v2190_v6, %v670_v34  ;;  %v2261_v40 = vsel %vm758_vm2, %v723_v26, %v741_v31  ;;  %v2264_v41 = vmul.f32 %v2190_v6, %v671_v35 }
  0x1b   : > { %v2268_v42 = vsel %vm758_vm2, %v724_v30, %v742_v32  ;;  %v837_v43 = vmul.f32 %v2235_v27, %v2224_v19  ;;  %v838_v44 = vmul.f32 %v2235_v27, %v2176_v3  ;;  %v839_v45 = vmul.f32 %v2235_v27, %v688_v36 }
  0x1c   : > { %v840_v46 = vmul.f32 %v2235_v27, %v651_v33  ;;  %v2277_v47 = vrot.slane %v2197_v7, %v871_v12  ;;  %v2280_v48 = vrot.slane %v2197_v7, %v939_v13  ;;  %v778_v49 = vsel %vm758_vm2, %v741_v31, %v723_v26  ;;  %v2312_v13 = vld [vmem:[%s3497_s3 + $0x8] ss:$0 sm:$0xff] }
  0x1d   : > { %v2285_v50 = vrot.slane %v2197_v7, %v1007_v20  ;;  %v2288_v51 = vrot.slane %v2197_v7, %v1075_v28  ;;  %v1143_v52 = vsub.s32 7, %v2174_v1  ;;  %v1211_v60 = vsub.s32 2, %v2174_v1 }
  0x1e   : > { %v873_v53 = vmul.f32 %v2277_v47, %v688_v36  ;;  %v874_v54 = vmul.f32 %v2277_v47, %v651_v33  ;;  %v875_v55 = vmul.f32 %v2277_v47, %v2257_v39  ;;  %v876_v56 = vmul.f32 %v2277_v47, %v652_v37 }
  0x1f   : > { %v941_v57 = vmul.f32 %v2280_v48, %v2257_v39  ;;  %v942_v58 = vmul.f32 %v2280_v48, %v652_v37  ;;  %v943_v59 = vmul.f32 %v2280_v48, %v2264_v41  ;;  %v944_v2 = vmul.f32 %v2280_v48, %v2254_v38 }
  0x20   : > { %v905_v61 = vadd.f32 %v873_v53, %v837_v43  ;;  %v906_v62 = vadd.f32 %v874_v54, %v838_v44  ;;  %v907_v63 = vadd.f32 %v875_v55, %v839_v45  ;;  %v908_v0 = vadd.f32 %v876_v56, %v840_v46 }
  0x21   : > { %v1009_v4 = vmul.f32 0.0, %v2285_v50  ;;  %v1011_v8 = vmul.f32 %v2285_v50, %v2201_v9  ;;  %v1077_v12 = vmul.f32 %v2288_v51, %v2201_v9  ;;  %v1079_v21 = vmul.f32 %v2288_v51, %v2207_v11 }
  0x22   : > { %v973_v17 = vadd.f32 %v941_v57, %v905_v61  ;;  %v974_v18 = vadd.f32 %v942_v58, %v906_v62  ;;  %v975_v20 = vadd.f32 %v943_v59, %v907_v63  ;;  %v2317_v22 = vmul.f32 %v2235_v27, %v652_v37 }
  0x23   : > { %v2320_v23 = vrot.slane %v2197_v7, %v1143_v52  ;;  %v2323_v24 = vrot.slane %v2197_v7, %v1211_v60  ;;  %v1279_v26 = vsub.s32 5, %v2174_v1  ;;  %v976_v28 = vadd.f32 %v944_v2, %v908_v0 }
  0x24   : > { %v1041_v29 = vadd.f32 %v1009_v4, %v973_v17  ;;  %v1042_v31 = vadd.f32 %v1009_v4, %v974_v18  ;;  %v1043_v33 = vadd.f32 %v1011_v8, %v975_v20  ;;  %v1349_v36 = vmul.f32 %v2312_v13, %v2268_v42  ;;  %v2375_v20 = vld [vmem:[%s2188_s29 + $0x30] sm:$0xff] }
  0x25   : > { %v1145_v34 = vmul.f32 %v2320_v23, %v2207_v11  ;;  %v2329_v35 = vrot.slane %v2197_v7, %v1279_v26  ;;  %v779_v37 = vsel %vm758_vm2, %v742_v32, %v724_v30  ;;  %v1213_v45 = vmul.f32 %v2323_v24, %v2181_v5 }
  0x26   : > { %v1109_v43 = vadd.f32 %v1077_v12, %v1041_v29  ;;  %v1111_v44 = vadd.f32 %v1079_v21, %v1043_v33  ;;  %v2339_v46 = vmul.f32 %v2231_v25, %v2181_v5  ;;  %v798_v7 = vmul.f32 %v2231_v25, %v778_v49  ;;  %v2380_v21 = vld [vmem:[%s3498_s4] ss:$0 sm:$0xff] }
  0x27   : > { %v1281_v52 = vmul.f32 %v2329_v35, %v2261_v40  ;;  %v1078_v53 = vmul.f32 %v2288_v51, %v2204_v10  ;;  %v1146_v30 = vmul.f32 %v2320_v23, %v2212_v14  ;;  %v2349_v54 = vmul.f32 %v2231_v25, %v779_v37 }
  0x28   : > { %3514 = vst [vmem:[#allocation7_spill] sm:$0xff] %v2339_v46  ;;  %v1177_v32 = vadd.f32 %v1145_v34, %v1109_v43  ;;  %v1214_v55 = vmul.f32 %v2323_v24, %v2339_v46  ;;  %v725_v56 = vrot.slane %v2215_v15, 1  ;;  %v1282_v58 = vmul.f32 %v2329_v35, %v798_v7  ;;  %v2387_v34 = vld [vmem:[%s2188_s29 + $0x38] sm:$0xff] }
  0x29   : > { %v1110_v57 = vadd.f32 %v1078_v53, %v1042_v31  ;;  %v743_v49 = vrot.slane %v2218_v16, 1  ;;  %v1147_v59 = vmul.f32 %v2320_v23, %v2215_v15  ;;  %v1350_v61 = vmul.f32 %v2312_v13, %v2349_v54 }
  0x2a   : > { %v1245_v60 = vadd.f32 %v1213_v45, %v1177_v32  ;;  %v1215_v62 = vmul.f32 %v2323_v24, %v2261_v40  ;;  %v1012_v63 = vmul.f32 %v2285_v50, %v2204_v10  ;;  %v1283_v8 = vmul.f32 %v2329_v35, %v2268_v42 }
  0x2b   : > { %v1178_v0 = vadd.f32 %v1146_v30, %v1110_v57  ;;  %v2366_v2 = vsel %vm758_vm2, %v725_v56, %v743_v49  ;;  %v1179_v4 = vadd.f32 %v1147_v59, %v1111_v44  ;;  %v780_v40 = vsel %vm758_vm2, %v743_v49, %v725_v56 }
  0x2c   : > { %v1313_v12 = vadd.f32 %v1281_v52, %v1245_v60  ;;  %v1351_v17 = vmul.f32 %v2312_v13, %v2366_v2  ;;  %v1044_v18 = vadd.f32 %v1012_v63, %v976_v28  ;;  %v1080_v31 = vmul.f32 %v2288_v51, %v2212_v14 }
  0x2d   : > { %v1246_v26 = vadd.f32 %v1214_v55, %v1178_v0  ;;  %v1247_v29 = vadd.f32 %v1215_v62, %v1179_v4  ;;  %v1148_v33 = vmul.f32 %v2320_v23, %v2218_v16  ;;  %v2391_v28 = vmul.f32 %v2235_v27, %v2264_v41 }
  0x2e   : > { %v877_v37 = vmul.f32 %v2277_v47, %v2264_v41  ;;  %v1381_v43 = vadd.f32 %v1349_v36, %v1313_v12  ;;  %v1216_v44 = vmul.f32 %v2323_v24, %v798_v7  ;;  %v1112_v53 = vadd.f32 %v1080_v31, %v1044_v18 }
  0x2f   : > { %v1314_v45 = vadd.f32 %v1282_v58, %v1246_v26  ;;  %v1315_v52 = vadd.f32 %v1283_v8, %v1247_v29  ;;  %v617_v30 = vrot.slane %v2375_v20, 7  ;;  %v2399_v55 = vmul.f32 %v2231_v25, %v780_v40 }
  0x30   : > { %v1420_v32 = vadd.f32 %v2380_v21, %v1381_v43  ;;  %v1284_v56 = vmul.f32 %v2329_v35, %v2349_v54  ;;  %v635_v57 = vrot.slane %v2387_v34, 7  ;;  %v1180_v36 = vadd.f32 %v1148_v33, %v1112_v53 }
  0x31   : > { %v1382_v49 = vadd.f32 %v1350_v61, %v1314_v45  ;;  %v1383_v41 = vadd.f32 %v1351_v17, %v1315_v52  ;;  %v841_v7 = vmul.f32 %v2235_v27, %v2257_v39  ;;  %v1352_v59 = vmul.f32 %v2312_v13, %v2399_v55 }
  0x32   : > { %v1484_v58 = vmul.f32 0.70710677, %v1420_v32  ;;  %v672_v60 = vsel %vm649_vm1, %v635_v57, %v617_v30  ;;  %v726_v62 = vrot.slane %v2375_v20, 1  ;;  %v1248_v4 = vadd.f32 %v1216_v44, %v1180_v36 }
  0x33   : > { %v1421_v63 = vadd.f32 %v2380_v21, %v1382_v49  ;;  %v1422_v0 = vadd.f32 %v2380_v21, %v1383_v41  ;;  %v744_v61 = vrot.slane %v2387_v34, 1  ;;  %v1452_v8 = vmul.f32 0.5, %v1420_v32 }
  0x34   : > { %2021 = verf.f32 %v1484_v58  ;;  %v2415_v39 = vmul.f32 %v2190_v6, %v672_v60  ;;  %v909_v12 = vadd.f32 %v877_v37, %v841_v7  ;;  %v1013_v26 = vmul.f32 %v2285_v50, %v2207_v11 }
  0x35   : > { %v1485_v17 = vmul.f32 0.70710677, %v1421_v63  ;;  %v1486_v40 = vmul.f32 0.70710677, %v1422_v0  ;;  %v2419_v18 = vsel %vm758_vm2, %v726_v62, %v744_v61  ;;  %v2423_v29 = vmul.f32 0.5, %v1421_v63 }
  0x36   : > { %v1316_v31 = vadd.f32 %v1284_v56, %v1248_v4  ;;  %v945_v33 = vmul.f32 %v2280_v48, %v2415_v39  ;;  %v1081_v43 = vmul.f32 %v2288_v51, %v2215_v15  ;;  %v2429_v37 = vmul.f32 0.5, %v1422_v0 }
  0x37   : > { %2023 = verf.f32 %v1485_v17  ;;  %v1149_v44 = vmul.f32 %v2320_v23, %v2375_v20  ;;  %v2435_v45 = vsel %vm649_vm1, %v617_v30, %v635_v57  ;;  %v781_v32 = vsel %vm758_vm2, %v744_v61, %v726_v62  ;;  %v2448_v30 = vld [vmem:[%s2188_s29 + $0x40] sm:$0xff] }
  0x38   : > { %2025 = verf.f32 %v1486_v40  ;;  %v1384_v52 = vadd.f32 %v1352_v59, %v1316_v31  ;;  %v977_v53 = vadd.f32 %v945_v33, %v909_v12  ;;  %v1217_v56 = vmul.f32 %v2323_v24, %v2268_v42  ;;  %v2457_v42 = vld [vmem:[%s2188_s29 + $0x48] sm:$0xff] }
  0x39   : > { %v1285_v49 = vmul.f32 %v2329_v35, %v2366_v2  ;;  %v878_v41 = vmul.f32 %v2277_v47, %v2254_v38  ;;  %v946_v36 = vmul.f32 %v2280_v48, %v2435_v45  ;;  %v1353_v58 = vmul.f32 %v2312_v13, %v2419_v18 }
  0x3a   : > { %v1423_v57 = vadd.f32 %v2380_v21, %v1384_v52  ;;  %v1045_v7 = vadd.f32 %v1013_v26, %v977_v53  ;;  %v2454_v59 = vmul.f32 %v2231_v25, %v781_v32  ;;  %v1014_v62 = vmul.f32 %v2285_v50, %v2212_v14 }
  0x3b   : > { %v910_v60 = vadd.f32 %v878_v41, %v2317_v22  ;;  %v1082_v63 = vmul.f32 %v2288_v51, %v2218_v16  ;;  %v1150_v0 = vmul.f32 %v2320_v23, %v2387_v34  ;;  %v1218_v12 = vmul.f32 %v2323_v24, %v2349_v54 }
  0x3c   : > { %v1487_v4 = vmul.f32 0.70710677, %v1423_v57  ;;  %v1113_v61 = vadd.f32 %v1081_v43, %v1045_v7  ;;  %v618_v17 = vrot.slane %v2448_v30, 7  ;;  %v1286_v22 = vmul.f32 %v2329_v35, %v2399_v55  ;;  %v2483_v7 = vld [vmem:[%s3499_s5] ss:$0 sm:$0xff] }
  0x3d   : > { %v978_v40 = vadd.f32 %v946_v36, %v910_v60  ;;  %v1354_v26 = vmul.f32 %v2312_v13, %v2454_v59  ;;  %v636_v31 = vrot.slane %v2457_v42, 7  ;;  %v727_v43 = vrot.slane %v2448_v30, 1 }
  0x3e   : > { %v2022_v33 = vpop.eup %2021  ;;  %2027 = verf.f32 %v1487_v4  ;;  %v1181_v52 = vadd.f32 %v1149_v44, %v1113_v61  ;;  %v879_v54 = vmul.f32 %v2277_v47, %v2415_v39  ;;  %v745_v36 = vrot.slane %v2457_v42, 1 }
  0x3f   : > { %v1548_v53 = vadd.f32 1.0, %v2022_v33  ;;  %v1046_v32 = vadd.f32 %v1014_v62, %v978_v40  ;;  %v673_v41 = vsel %vm649_vm1, %v636_v31, %v618_v17  ;;  %v1455_v60 = vmul.f32 0.5, %v1423_v57 }
  0x40   : > { %v1249_v4 = vadd.f32 %v1217_v56, %v1181_v52  ;;  %v2486_v44 = vmul.f32 %v2190_v6, %v673_v41  ;;  %v911_v61 = vadd.f32 %v879_v54, %v2391_v28  ;;  %v2491_v40 = vsel %vm758_vm2, %v727_v43, %v745_v36  ;;  %v2498_v56 = vld [vmem:[%s3500_s6] ss:$0 sm:$0xff] }
  0x41   : > { %v2024_v46 = vpop.eup %2023  ;;  %v1580_v33 = vmul.f32 %v1548_v53, %v1452_v8  ;;  %v1114_v62 = vadd.f32 %v1082_v63, %v1046_v32  ;;  %v1015_v5 = vmul.f32 %v2285_v50, %v2215_v15  ;;  %v1083_v8 = vmul.f32 %v2288_v51, %v2375_v20 }
  0x42   : > { %v2026_v3 = vpop.eup %2025  ;;  %v1549_v57 = vadd.f32 1.0, %v2024_v46  ;;  %v1317_v52 = vadd.f32 %v1285_v49, %v1249_v4  ;;  %v947_v28 = vmul.f32 %v2280_v48, %v2486_v44  ;;  %v1151_v32 = vmul.f32 %v2320_v23, %v2448_v30 }
  0x43   : > { %v1619_v63 = vmul.f32 %v2483_v7, %v1580_v33  ;;  %v1550_v54 = vadd.f32 1.0, %v2026_v3  ;;  %v1182_v53 = vadd.f32 %v1150_v0, %v1114_v62  ;;  %v1219_v46 = vmul.f32 %v2323_v24, %v2366_v2 }
  0x44   : > { %v1581_v41 = vmul.f32 %v1549_v57, %v2423_v29  ;;  %v1385_v19 = vadd.f32 %v1353_v58, %v1317_v52  ;;  %v979_v15 = vadd.f32 %v947_v28, %v911_v61  ;;  %v1287_v33 = vmul.f32 %v2329_v35, %v2419_v18 }
  0x45   : > { %v1658_v49 = vadd.f32 %v2498_v56, %v1619_v63  ;;  %v1582_v4 = vmul.f32 %v1550_v54, %v2429_v37  ;;  %v1250_v6 = vadd.f32 %v1218_v12, %v1182_v53  ;;  %v2525_v58 = vsel %vm649_vm1, %v618_v17, %v636_v31  ;;  %v2551_v54 = vld [vmem:[%s2188_s29 + $0x50] sm:$0xff] }
  0x46   : > { %v1620_v3 = vmul.f32 %v2483_v7, %v1581_v41  ;;  %v1424_v29 = vadd.f32 %v2380_v21, %v1385_v19  ;;  %v1047_v2 = vadd.f32 %v1015_v5, %v979_v15  ;;  %v844_v61 = vmul.f32 %v2235_v27, %v2254_v38  ;;  %v2559_v41 = vld [vmem:[%s2188_s29 + $0x58] sm:$0xff] }
  0x47   : > { %v1690_v37 = vadd.f32 %v1658_v49, %v2201_v9  ;;  %v1621_v0 = vmul.f32 %v2483_v7, %v1582_v4  ;;  %v1318_v12 = vadd.f32 %v1286_v22, %v1250_v6  ;;  %v782_v5 = vsel %vm758_vm2, %v745_v36, %v727_v43 }
  0x48   : > { %v2028_v62 = vpop.eup %2027  ;;  %v1659_v57 = vadd.f32 %v2498_v56, %v1620_v3  ;;  %v1488_v52 = vmul.f32 0.70710677, %v1424_v29  ;;  %v1115_v28 = vadd.f32 %v1083_v8, %v1047_v2  ;;  %v880_v19 = vmul.f32 %v2277_v47, %v2435_v45 }
  0x49   : > { %1723 = vst.msk [vmem:[%s2519_s19] sm:$0xff] %vm1722_vm4, %v1690_v37  ;;  %v1660_v15 = vadd.f32 %v2498_v56, %v1621_v0  ;;  %v1551_v9 = vadd.f32 1.0, %v2028_v62  ;;  %v1386_v6 = vadd.f32 %v1354_v26, %v1318_v12  ;;  %v948_v22 = vmul.f32 %v2280_v48, %v2525_v58 }
  0x4a   : > { %v1691_v38 = vadd.f32 %v1659_v57, %v2204_v10  ;;  %2029 = verf.f32 %v1488_v52  ;;  %v1183_v17 = vadd.f32 %v1151_v32, %v1115_v28  ;;  %v912_v8 = vadd.f32 %v880_v19, %v844_v61 }
  0x4b   : > { %v1692_v31 = vadd.f32 %v1660_v15, %v2207_v11  ;;  %v1583_v43 = vmul.f32 %v1551_v9, %v1455_v60  ;;  %v1425_v36 = vadd.f32 %v2380_v21, %v1386_v6  ;;  %v1355_v63 = vmul.f32 %v2312_v13, %v2491_v40  ;;  %v3515_v6 = vld [vmem:[#allocation4_spill] sm:$0xff] }
  0x4c   : > { %1724 = vst.msk [vmem:[%s2519_s19 + $0x8] sm:$0xff] %vm1722_vm4, %v1691_v38  ;;  %v1251_v26 = vadd.f32 %v1219_v46, %v1183_v17  ;;  %v1016_v10 = vmul.f32 %v2285_v50, %v2218_v16  ;;  %v980_v60 = vadd.f32 %v948_v22, %v912_v8  ;;  %v1084_v32 = vmul.f32 %v2288_v51, %v2387_v34 }
  0x4d   : > { %1725 = vst.msk [vmem:[%s2519_s19 + $0x10] sm:$0xff] %vm1722_vm4, %v1692_v31  ;;  %v1622_v53 = vmul.f32 %v2483_v7, %v1583_v43  ;;  %v1489_v11 = vmul.f32 0.70710677, %v1425_v36  ;;  %v2562_v49 = vmul.f32 %v2231_v25, %v782_v5  ;;  %v1152_v4 = vmul.f32 %v2320_v23, %v2457_v42 }
  0x4e   : > { %v1319_v46 = vadd.f32 %v1287_v33, %v1251_v26  ;;  %v1048_v2 = vadd.f32 %v1016_v10, %v980_v60  ;;  %v619_v37 = vrot.slane %v2551_v54, 7  ;;  %v1456_v0 = vmul.f32 0.5, %v1424_v29 }
  0x4f   : > { %v1661_v3 = vadd.f32 %v2498_v56, %v1622_v53  ;;  %2031 = verf.f32 %v1489_v11  ;;  %v1220_v61 = vmul.f32 %v2323_v24, %v2399_v55  ;;  %v637_v33 = vrot.slane %v2559_v41, 7 }
  0x50   : > { %v1387_v12 = vadd.f32 %v1355_v63, %v1319_v46  ;;  %v1116_v57 = vadd.f32 %v1084_v32, %v1048_v2  ;;  %v845_v52 = vmul.f32 %v2235_v27, %v2415_v39  ;;  %v881_v28 = vmul.f32 %v2277_v47, %v2486_v44 }
  0x51   : > { %v1693_v62 = vadd.f32 %v1661_v3, %v2212_v14  ;;  %v674_v29 = vsel %vm649_vm1, %v637_v33, %v619_v37  ;;  %v728_v15 = vrot.slane %v2551_v54, 1  ;;  %v746_v55 = vrot.slane %v2559_v41, 1 }
  0x52   : > { %v1426_v5 = vadd.f32 %v2380_v21, %v1387_v12  ;;  %v1184_v9 = vadd.f32 %v1152_v4, %v1116_v57  ;;  %v1288_v14 = vmul.f32 %v2329_v35, %v2454_v59  ;;  %v2586_v39 = vmul.f32 %v3515_v6, %v674_v29 }
  0x53   : > { %1726 = vst.msk [vmem:[%s2519_s19 + $0x18] sm:$0xff] %vm1722_vm4, %v1693_v62  ;;  %v913_v19 = vadd.f32 %v881_v28, %v845_v52  ;;  %v1457_v17 = vmul.f32 0.5, %v1425_v36  ;;  %v1356_v31 = vmul.f32 %v2312_v13, %v2562_v49  ;;  %v2592_v43 = vsel %vm758_vm2, %v728_v15, %v746_v55 }
  0x54   : > { %v2030_v38 = vpop.eup %2029  ;;  %v1490_v22 = vmul.f32 0.70710677, %v1426_v5  ;;  %v1252_v26 = vadd.f32 %v1220_v61, %v1184_v9  ;;  %v949_v63 = vmul.f32 %v2280_v48, %v2586_v39  ;;  %v1017_v10 = vmul.f32 %v2285_v50, %v2375_v20 }
  0x55   : > { %v1552_v8 = vadd.f32 1.0, %v2030_v38  ;;  %v1458_v53 = vmul.f32 0.5, %v1426_v5  ;;  %v1085_v36 = vmul.f32 %v2288_v51, %v2448_v30  ;;  %v1153_v11 = vmul.f32 %v2320_v23, %v2551_v54  ;;  %v2629_v38 = vld [vmem:[%s2188_s29 + $0x68] sm:$0xff] }
  0x56   : > { %2033 = verf.f32 %v1490_v22  ;;  %v1320_v32 = vadd.f32 %v1288_v14, %v1252_v26  ;;  %v981_v46 = vadd.f32 %v949_v63, %v913_v19  ;;  %v2604_v4 = vsel %vm649_vm1, %v619_v37, %v637_v33  ;;  %v2618_v33 = vld [vmem:[%s2188_s29 + $0x60] sm:$0xff] }
  0x57   : > { %v1584_v60 = vmul.f32 %v1552_v8, %v1456_v0  ;;  %v1221_v3 = vmul.f32 %v2323_v24, %v2419_v18  ;;  %v846_v2 = vmul.f32 %v2235_v27, %v2435_v45  ;;  %v882_v12 = vmul.f32 %v2277_v47, %v2525_v58  ;;  %v3516_v8 = vld [vmem:[#allocation5_spill] sm:$0xff] }
  0x58   : > { %v950_v61 = vmul.f32 %v2280_v48, %v2604_v4  ;;  %v1388_v57 = vadd.f32 %v1356_v31, %v1320_v32  ;;  %v1049_v52 = vadd.f32 %v1017_v10, %v981_v46  ;;  %v1289_v37 = vmul.f32 %v2329_v35, %v2491_v40 }
  0x59   : > { %v2032_v0 = vpop.eup %2031  ;;  %v1623_v62 = vmul.f32 %v2483_v7, %v1584_v60  ;;  %v783_v45 = vsel %vm758_vm2, %v746_v55, %v728_v15  ;;  %v914_v28 = vadd.f32 %v882_v12, %v846_v2  ;;  %v1018_v5 = vmul.f32 %v2285_v50, %v2387_v34 }
  0x5a   : > { %v1553_v18 = vadd.f32 1.0, %v2032_v0  ;;  %v1427_v9 = vadd.f32 %v2380_v21, %v1388_v57  ;;  %v1117_v14 = vadd.f32 %v1085_v36, %v1049_v52  ;;  %v1357_v19 = vmul.f32 %v2312_v13, %v2592_v43 }
  0x5b   : > { %v1662_v29 = vadd.f32 %v2498_v56, %v1623_v62  ;;  %v982_v31 = vadd.f32 %v950_v61, %v914_v28  ;;  %v1086_v15 = vmul.f32 %v2288_v51, %v2457_v42  ;;  %v620_v55 = vrot.slane %v2618_v33, 7 }
  0x5c   : > { %v1585_v22 = vmul.f32 %v1553_v18, %v1457_v17  ;;  %v1491_v63 = vmul.f32 0.70710677, %v1427_v9  ;;  %v1185_v10 = vadd.f32 %v1153_v11, %v1117_v14  ;;  %v2636_v60 = vmul.f32 %v2231_v25, %v783_v45 }
  0x5d   : > { %v1694_v26 = vadd.f32 %v1662_v29, %v3516_v8  ;;  %v1050_v32 = vadd.f32 %v1018_v5, %v982_v31  ;;  %v1154_v46 = vmul.f32 %v2320_v23, %v2559_v41  ;;  %v638_v17 = vrot.slane %v2629_v38, 7 }
  0x5e   : > { %v1624_v36 = vmul.f32 %v2483_v7, %v1585_v22  ;;  %2035 = verf.f32 %v1491_v63  ;;  %v1253_v2 = vadd.f32 %v1221_v3, %v1185_v10  ;;  %v1222_v12 = vmul.f32 %v2323_v24, %v2454_v59 }
  0x5f   : > { %1727 = vst.msk [vmem:[%s2519_s19 + $0x20] sm:$0xff] %vm1722_vm4, %v1694_v26  ;;  %v847_v11 = vmul.f32 %v2235_v27, %v2486_v44  ;;  %v1118_v62 = vadd.f32 %v1086_v15, %v1050_v32  ;;  %v675_v57 = vsel %vm649_vm1, %v638_v17, %v620_v55  ;;  %v883_v52 = vmul.f32 %v2277_v47, %v2586_v39 }
  0x60   : > { %v2034_v61 = vpop.eup %2033  ;;  %v1663_v0 = vadd.f32 %v2498_v56, %v1624_v36  ;;  %v1321_v45 = vadd.f32 %v1289_v37, %v1253_v2  ;;  %v1290_v3 = vmul.f32 %v2329_v35, %v2562_v49  ;;  %v2656_v59 = vmul.f32 %v3515_v6, %v675_v57 }
  0x61   : > { %v1554_v18 = vadd.f32 1.0, %v2034_v61  ;;  %v1186_v28 = vadd.f32 %v1154_v46, %v1118_v62  ;;  %v1358_v5 = vmul.f32 %v2312_v13, %v2636_v60  ;;  %v915_v29 = vadd.f32 %v883_v52, %v847_v11 }
  0x62   : > { %v1695_v44 = vadd.f32 %v1663_v0, %v2218_v16  ;;  %v1389_v22 = vadd.f32 %v1357_v19, %v1321_v45  ;;  %v951_v31 = vmul.f32 %v2280_v48, %v2656_v59  ;;  %v1019_v37 = vmul.f32 %v2285_v50, %v2448_v30 }
  0x63   : > { %v1586_v14 = vmul.f32 %v1554_v18, %v1458_v53  ;;  %v1459_v15 = vmul.f32 0.5, %v1427_v9  ;;  %v1254_v8 = vadd.f32 %v1222_v12, %v1186_v28  ;;  %v729_v26 = vrot.slane %v2618_v33, 1  ;;  %v2699_v28 = vld [vmem:[%s2188_s29 + $0x70] sm:$0xff] }
  0x64   : > { %1728 = vst.msk [vmem:[%s2519_s19 + $0x28] sm:$0xff] %vm1722_vm4, %v1695_v44  ;;  %v747_v16 = vrot.slane %v2629_v38, 1  ;;  %v1428_v10 = vadd.f32 %v2380_v21, %v1389_v22  ;;  %v983_v53 = vadd.f32 %v951_v31, %v915_v29  ;;  %v1087_v19 = vmul.f32 %v2288_v51, %v2551_v54 }
  0x65   : > { %v1625_v63 = vmul.f32 %v2483_v7, %v1586_v14  ;;  %v1322_v36 = vadd.f32 %v1290_v3, %v1254_v8  ;;  %v1155_v9 = vmul.f32 %v2320_v23, %v2618_v33  ;;  %v848_v46 = vmul.f32 %v2235_v27, %v2525_v58 }
  0x66   : > { %v2675_v32 = vsel %vm758_vm2, %v729_v26, %v747_v16  ;;  %v1492_v12 = vmul.f32 0.70710677, %v1428_v10  ;;  %v1051_v11 = vadd.f32 %v1019_v37, %v983_v53  ;;  %v2684_v61 = vsel %vm649_vm1, %v620_v55, %v638_v17 }
  0x67   : > { %v1664_v2 = vadd.f32 %v2498_v56, %v1625_v63  ;;  %v1390_v0 = vadd.f32 %v1358_v5, %v1322_v36  ;;  %v1223_v62 = vmul.f32 %v2323_v24, %v2491_v40  ;;  %v884_v57 = vmul.f32 %v2277_v47, %v2604_v4  ;;  %v2702_v5 = vld [vmem:[%s2188_s29 + $0x78] sm:$0xff] }
  0x68   : > { %v952_v58 = vmul.f32 %v2280_v48, %v2684_v61  ;;  %v2036_v52 = vpop.eup %2035  ;;  %2037 = verf.f32 %v1492_v12  ;;  %v1119_v45 = vadd.f32 %v1087_v19, %v1051_v11  ;;  %v784_v55 = vsel %vm758_vm2, %v747_v16, %v729_v26 }
  0x69   : > { %v1696_v18 = vadd.f32 %v1664_v2, %v2375_v20  ;;  %v1555_v17 = vadd.f32 1.0, %v2036_v52  ;;  %v1429_v3 = vadd.f32 %v2380_v21, %v1390_v0  ;;  %v916_v44 = vadd.f32 %v884_v57, %v848_v46 }
  0x6a   : > { %v1020_v40 = vmul.f32 %v2285_v50, %v2457_v42  ;;  %v1460_v29 = vmul.f32 0.5, %v1428_v10  ;;  %v1187_v20 = vadd.f32 %v1155_v9, %v1119_v45  ;;  %v1291_v14 = vmul.f32 %v2329_v35, %v2592_v43 }
  0x6b   : > { %1729 = vst.msk [vmem:[%s2519_s19 + $0x30] sm:$0xff] %vm1722_vm4, %v1696_v18  ;;  %v1359_v22 = vmul.f32 %v2312_v13, %v2675_v32  ;;  %v1587_v31 = vmul.f32 %v1555_v17, %v1459_v15  ;;  %v1493_v37 = vmul.f32 0.70710677, %v1429_v3  ;;  %v984_v8 = vadd.f32 %v952_v58, %v916_v44 }
  0x6c   : > { %v1088_v26 = vmul.f32 %v2288_v51, %v2559_v41  ;;  %v1255_v16 = vadd.f32 %v1223_v62, %v1187_v20  ;;  %v2713_v63 = vmul.f32 %v2231_v25, %v784_v55  ;;  %v621_v53 = vrot.slane %v2699_v28, 7 }
  0x6d   : > { %v639_v10 = vrot.slane %v2702_v5, 7  ;;  %v1626_v19 = vmul.f32 %v2483_v7, %v1587_v31  ;;  %2039 = verf.f32 %v1493_v37  ;;  %v1052_v36 = vadd.f32 %v1020_v40, %v984_v8 }
  0x6e   : > { %v1156_v15 = vmul.f32 %v2320_v23, %v2629_v38  ;;  %v1323_v9 = vadd.f32 %v1291_v14, %v1255_v16  ;;  %v1224_v46 = vmul.f32 %v2323_v24, %v2562_v49  ;;  %v849_v12 = vmul.f32 %v2235_v27, %v2586_v39 }
  0x6f   : > { %v676_v2 = vsel %vm649_vm1, %v639_v10, %v621_v53  ;;  %v1665_v11 = vadd.f32 %v2498_v56, %v1626_v19  ;;  %v1120_v0 = vadd.f32 %v1088_v26, %v1052_v36  ;;  %v885_v57 = vmul.f32 %v2277_v47, %v2656_v59 }
  0x70   : > { %v2728_v62 = vmul.f32 %v3515_v6, %v676_v2  ;;  %v1461_v58 = vmul.f32 0.5, %v1429_v3  ;;  %v1391_v52 = vadd.f32 %v1359_v22, %v1323_v9  ;;  %v1292_v49 = vmul.f32 %v2329_v35, %v2636_v60 }
  0x71   : > { %v1021_v18 = vmul.f32 %v2285_v50, %v2551_v54  ;;  %v1697_v39 = vadd.f32 %v1665_v11, %v2387_v34  ;;  %v1188_v45 = vadd.f32 %v1156_v15, %v1120_v0  ;;  %v917_v55 = vadd.f32 %v885_v57, %v849_v12 }
  0x72   : > { %v953_v17 = vmul.f32 %v2280_v48, %v2728_v62  ;;  %v2038_v44 = vpop.eup %2037  ;;  %v1430_v40 = vadd.f32 %v2380_v21, %v1391_v52  ;;  %v1360_v3 = vmul.f32 %v2312_v13, %v2713_v63  ;;  %v730_v20 = vrot.slane %v2699_v28, 1 }
  0x73   : > { %v748_v14 = vrot.slane %v2702_v5, 1  ;;  %1730 = vst.msk [vmem:[%s2519_s19 + $0x38] sm:$0xff] %vm1722_vm4, %v1697_v39  ;;  %v1556_v22 = vadd.f32 1.0, %v2038_v44  ;;  %v1256_v31 = vadd.f32 %v1224_v46, %v1188_v45  ;;  %v1089_v37 = vmul.f32 %v2288_v51, %v2618_v33  ;;  %v2779_v44 = vld [vmem:[%s2188_s29 + $0x88] sm:$0xff] }
  0x74   : > { %v985_v34 = vadd.f32 %v953_v17, %v917_v55  ;;  %v1494_v8 = vmul.f32 0.70710677, %v1430_v40  ;;  %v1157_v16 = vmul.f32 %v2320_v23, %v2699_v28  ;;  %v1225_v19 = vmul.f32 %v2323_v24, %v2592_v43  ;;  %v2776_v17 = vld [vmem:[%s2188_s29 + $0x80] sm:$0xff] }
  0x75   : > { %v2750_v26 = vsel %vm758_vm2, %v730_v20, %v748_v14  ;;  %v1588_v36 = vmul.f32 %v1556_v22, %v1460_v29  ;;  %v1324_v15 = vadd.f32 %v1292_v49, %v1256_v31  ;;  %v2758_v46 = vsel %vm649_vm1, %v621_v53, %v639_v10 }
  0x76   : > { %v1053_v9 = vadd.f32 %v1021_v18, %v985_v34  ;;  %2041 = verf.f32 %v1494_v8  ;;  %v850_v2 = vmul.f32 %v2235_v27, %v2604_v4  ;;  %v886_v12 = vmul.f32 %v2277_v47, %v2684_v61 }
  0x77   : > { %v954_v11 = vmul.f32 %v2280_v48, %v2758_v46  ;;  %v2040_v43 = vpop.eup %2039  ;;  %v1627_v29 = vmul.f32 %v2483_v7, %v1588_v36  ;;  %v1392_v0 = vadd.f32 %v1360_v3, %v1324_v15  ;;  %v1293_v53 = vmul.f32 %v2329_v35, %v2675_v32 }
  0x78   : > { %v1121_v57 = vadd.f32 %v1089_v37, %v1053_v9  ;;  %v1557_v10 = vadd.f32 1.0, %v2040_v43  ;;  %v1361_v4 = vmul.f32 %v2312_v13, %v2750_v26  ;;  %v918_v52 = vadd.f32 %v886_v12, %v850_v2 }
  0x79   : > { %v1022_v49 = vmul.f32 %v2285_v50, %v2559_v41  ;;  %v1666_v18 = vadd.f32 %v2498_v56, %v1627_v29  ;;  %v1462_v39 = vmul.f32 0.5, %v1430_v40  ;;  %v1431_v45 = vadd.f32 %v2380_v21, %v1392_v0 }
  0x7a   : > { %v1189_v55 = vadd.f32 %v1157_v16, %v1121_v57  ;;  %v1589_v3 = vmul.f32 %v1557_v10, %v1461_v58  ;;  %v785_v22 = vsel %vm758_vm2, %v748_v14, %v730_v20  ;;  %v986_v31 = vadd.f32 %v954_v11, %v918_v52 }
  0x7b   : > { %v1090_v34 = vmul.f32 %v2288_v51, %v2629_v38  ;;  %v1698_v37 = vadd.f32 %v1666_v18, %v2448_v30  ;;  %v1495_v8 = vmul.f32 0.70710677, %v1431_v45  ;;  %v1158_v36 = vmul.f32 %v2320_v23, %v2702_v5 }
  0x7c   : > { %v1257_v40 = vadd.f32 %v1225_v19, %v1189_v55  ;;  %v1628_v16 = vmul.f32 %v2483_v7, %v1589_v3  ;;  %v1054_v15 = vadd.f32 %v1022_v49, %v986_v31  ;;  %v622_v9 = vrot.slane %v2776_v17, 7 }
  0x7d   : > { %v640_v58 = vrot.slane %v2779_v44, 7  ;;  %1731 = vst.msk [vmem:[%s2519_s19 + $0x40] sm:$0xff] %vm1722_vm4, %v1698_v37  ;;  %2043 = verf.f32 %v1495_v8  ;;  %v2794_v14 = vmul.f32 %v2231_v25, %v785_v22  ;;  %v1226_v30 = vmul.f32 %v2323_v24, %v2636_v60 }
  0x7e   : > { %v1325_v20 = vadd.f32 %v1293_v53, %v1257_v40  ;;  %v1667_v19 = vadd.f32 %v2498_v56, %v1628_v16  ;;  %v1122_v2 = vadd.f32 %v1090_v34, %v1054_v15  ;;  %v851_v11 = vmul.f32 %v2235_v27, %v2656_v59 }
  0x7f   : > { %v677_v12 = vsel %vm649_vm1, %v640_v58, %v622_v9  ;;  %v1294_v29 = vmul.f32 %v2329_v35, %v2713_v63  ;;  %v887_v60 = vmul.f32 %v2277_v47, %v2728_v62  ;;  %v1362_v52 = vmul.f32 %v2312_v13, %v2794_v14 }
  0x80   : > { %v1393_v43 = vadd.f32 %v1361_v4, %v1325_v20  ;;  %v2806_v0 = vmul.f32 %v3515_v6, %v677_v12  ;;  %v2042_v57 = vpop.eup %2041  ;;  %v1699_v53 = vadd.f32 %v1667_v19, %v2457_v42  ;;  %v1190_v10 = vadd.f32 %v1158_v36, %v1122_v2 }
  0x81   : > { %v1023_v59 = vmul.f32 %v2285_v50, %v2618_v33  ;;  %v1558_v4 = vadd.f32 1.0, %v2042_v57  ;;  %v919_v18 = vadd.f32 %v887_v60, %v851_v11  ;;  %v1463_v3 = vmul.f32 0.5, %v1431_v45 }
  0x82   : > { %v1432_v49 = vadd.f32 %v2380_v21, %v1393_v43  ;;  %v955_v55 = vmul.f32 %v2280_v48, %v2806_v0  ;;  %1732 = vst.msk [vmem:[%s2519_s19 + $0x48] sm:$0xff] %vm1722_vm4, %v1699_v53  ;;  %v1258_v22 = vadd.f32 %v1226_v30, %v1190_v10  ;;  %v731_v42 = vrot.slane %v2776_v17, 1  ;;  %v2852_v10 = vld [vmem:[%s2188_s29 + $0x90] sm:$0xff] }
  0x83   : > { %v749_v31 = vrot.slane %v2779_v44, 1  ;;  %v1590_v34 = vmul.f32 %v1558_v4, %v1462_v39  ;;  %v1091_v40 = vmul.f32 %v2288_v51, %v2699_v28  ;;  %v1159_v15 = vmul.f32 %v2320_v23, %v2776_v17 }
  0x84   : > { %v1496_v37 = vmul.f32 0.70710677, %v1432_v49  ;;  %v987_v8 = vadd.f32 %v955_v55, %v919_v18  ;;  %v1326_v36 = vadd.f32 %v1294_v29, %v1258_v22  ;;  %v1227_v45 = vmul.f32 %v2323_v24, %v2675_v32 }
  0x85   : > { %v2826_v16 = vsel %vm758_vm2, %v731_v42, %v749_v31  ;;  %v1629_v20 = vmul.f32 %v2483_v7, %v1590_v34  ;;  %v2835_v30 = vsel %vm649_vm1, %v622_v9, %v640_v58  ;;  %v852_v2 = vmul.f32 %v2235_v27, %v2684_v61 }
  0x86   : > { %2045 = verf.f32 %v1496_v37  ;;  %v1055_v39 = vadd.f32 %v1023_v59, %v987_v8  ;;  %v1394_v19 = vadd.f32 %v1362_v52, %v1326_v36  ;;  %v888_v12 = vmul.f32 %v2277_v47, %v2758_v46  ;;  %v2855_v52 = vld [vmem:[%s2188_s29 + $0x98] sm:$0xff] }
  0x87   : > { %v956_v32 = vmul.f32 %v2280_v48, %v2835_v30  ;;  %v2044_v11 = vpop.eup %2043  ;;  %v1668_v43 = vadd.f32 %v2498_v56, %v1629_v20  ;;  %v1295_v60 = vmul.f32 %v2329_v35, %v2750_v26  ;;  %v786_v9 = vsel %vm758_vm2, %v749_v31, %v731_v42 }
  0x88   : > { %v1123_v29 = vadd.f32 %v1091_v40, %v1055_v39  ;;  %v1559_v58 = vadd.f32 1.0, %v2044_v11  ;;  %v1433_v61 = vadd.f32 %v2380_v21, %v1394_v19  ;;  %v920_v57 = vadd.f32 %v888_v12, %v852_v2 }
  0x89   : > { %v1024_v53 = vmul.f32 %v2285_v50, %v2629_v38  ;;  %v1700_v59 = vadd.f32 %v1668_v43, %v2551_v54  ;;  %v1464_v4 = vmul.f32 0.5, %v1432_v49  ;;  %v1363_v55 = vmul.f32 %v2312_v13, %v2826_v16 }
  0x8a   : > { %v1191_v18 = vadd.f32 %v1159_v15, %v1123_v29  ;;  %v1591_v22 = vmul.f32 %v1559_v58, %v1463_v3  ;;  %v1497_v42 = vmul.f32 0.70710677, %v1433_v61  ;;  %v988_v31 = vadd.f32 %v956_v32, %v920_v57 }
  0x8b   : > { %v1092_v34 = vmul.f32 %v2288_v51, %v2702_v5  ;;  %1733 = vst.msk [vmem:[%s2519_s19 + $0x50] sm:$0xff] %vm1722_vm4, %v1700_v59  ;;  %v2865_v8 = vmul.f32 %v2231_v25, %v786_v9  ;;  %v623_v40 = vrot.slane %v2852_v10, 7  ;;  %v641_v54 = vrot.slane %v2855_v52, 7 }
  0x8c   : > { %v1259_v37 = vadd.f32 %v1227_v45, %v1191_v18  ;;  %v1630_v49 = vmul.f32 %v2483_v7, %v1591_v22  ;;  %2047 = verf.f32 %v1497_v42  ;;  %v1056_v36 = vadd.f32 %v1024_v53, %v988_v31 }
  0x8d   : > { %v1160_v3 = vmul.f32 %v2320_v23, %v2779_v44  ;;  %v1228_v20 = vmul.f32 %v2323_v24, %v2713_v63  ;;  %v678_v45 = vsel %vm649_vm1, %v641_v54, %v623_v40  ;;  %v853_v39 = vmul.f32 %v2235_v27, %v2728_v62 }
  0x8e   : > { %v1327_v15 = vadd.f32 %v1295_v60, %v1259_v37  ;;  %v1669_v19 = vadd.f32 %v2498_v56, %v1630_v49  ;;  %v1124_v2 = vadd.f32 %v1092_v34, %v1056_v36  ;;  %v1296_v12 = vmul.f32 %v2329_v35, %v2794_v14 }
  0x8f   : > { %v889_v32 = vmul.f32 %v2277_v47, %v2806_v0  ;;  %v2884_v63 = vmul.f32 %v3515_v6, %v678_v45  ;;  %v732_v29 = vrot.slane %v2852_v10, 1  ;;  %v750_v60 = vrot.slane %v2855_v52, 1 }
  0x90   : > { %v2046_v11 = vpop.eup %2045  ;;  %v1395_v43 = vadd.f32 %v1363_v55, %v1327_v15  ;;  %v1701_v62 = vadd.f32 %v1669_v19, %v2559_v41  ;;  %v1192_v58 = vadd.f32 %v1160_v3, %v1124_v2  ;;  %v1465_v53 = vmul.f32 0.5, %v1433_v61 }
  0x91   : > { %v1560_v9 = vadd.f32 1.0, %v2046_v11  ;;  %v921_v57 = vadd.f32 %v889_v32, %v853_v39  ;;  %v957_v18 = vmul.f32 %v2280_v48, %v2884_v63  ;;  %v1025_v55 = vmul.f32 %v2285_v50, %v2699_v28 }
  0x92   : > { %v1434_v59 = vadd.f32 %v2380_v21, %v1395_v43  ;;  %1734 = vst.msk [vmem:[%s2519_s19 + $0x58] sm:$0xff] %vm1722_vm4, %v1701_v62  ;;  %v1260_v42 = vadd.f32 %v1228_v20, %v1192_v58  ;;  %v1364_v31 = vmul.f32 %v2312_v13, %v2865_v8  ;;  %v2900_v41 = vsel %vm758_vm2, %v732_v29, %v750_v60 }
  0x93   : > { %v1592_v22 = vmul.f32 %v1560_v9, %v1464_v4  ;;  %v989_v34 = vadd.f32 %v957_v18, %v921_v57  ;;  %v1093_v37 = vmul.f32 %v2288_v51, %v2776_v17  ;;  %v1161_v49 = vmul.f32 %v2320_v23, %v2852_v10  ;;  %v2932_v9 = vld [vmem:[%s3497_s3 + $0x8] ss:$0 sm:$0xff] }
  0x94   : > { %v1498_v61 = vmul.f32 0.70710677, %v1434_v59  ;;  %v1328_v3 = vadd.f32 %v1296_v12, %v1260_v42  ;;  %v1229_v4 = vmul.f32 %v2323_v24, %v2750_v26  ;;  %v854_v13 = vmul.f32 %v2235_v27, %v2758_v46  ;;  %v2939_v18 = vld [vmem:[%s2188_s29 + $0xa8] sm:$0xff] }
  0x95   : > { %v1631_v36 = vmul.f32 %v2483_v7, %v1592_v22  ;;  %v1057_v15 = vadd.f32 %v1025_v55, %v989_v34  ;;  %v2913_v20 = vsel %vm649_vm1, %v623_v40, %v641_v54  ;;  %v890_v45 = vmul.f32 %v2277_v47, %v2835_v30  ;;  %v2925_v54 = vld [vmem:[%s2188_s29 + $0xa0] sm:$0xff] }
  0x96   : > { %2049 = verf.f32 %v1498_v61  ;;  %v2048_v39 = vpop.eup %2047  ;;  %v1396_v2 = vadd.f32 %v1364_v31, %v1328_v3  ;;  %v1297_v26 = vmul.f32 %v2329_v35, %v2826_v16  ;;  %v958_v46 = vmul.f32 %v2280_v48, %v2913_v20 }
  0x97   : > { %v1670_v19 = vadd.f32 %v2498_v56, %v1631_v36  ;;  %v1561_v12 = vadd.f32 1.0, %v2048_v39  ;;  %v1125_v32 = vadd.f32 %v1093_v37, %v1057_v15  ;;  %v922_v11 = vadd.f32 %v890_v45, %v854_v13 }
  0x98   : > { %v1026_v40 = vmul.f32 %v2285_v50, %v2702_v5  ;;  %v1435_v62 = vadd.f32 %v2380_v21, %v1396_v2  ;;  %v1365_v58 = vmul.f32 %v2932_v9, %v2900_v41  ;;  %v787_v57 = vsel %vm758_vm2, %v750_v60, %v732_v29 }
  0x99   : > { %v1702_v43 = vadd.f32 %v1670_v19, %v2618_v33  ;;  %v1593_v55 = vmul.f32 %v1561_v12, %v1465_v53  ;;  %v1193_v22 = vadd.f32 %v1161_v49, %v1125_v32  ;;  %v990_v42 = vadd.f32 %v958_v46, %v922_v11 }
  0x9a   : > { %v1094_v33 = vmul.f32 %v2288_v51, %v2779_v44  ;;  %v1466_v21 = vmul.f32 0.5, %v1434_v59  ;;  %v1499_v31 = vmul.f32 0.70710677, %v1435_v62  ;;  %v1162_v61 = vmul.f32 %v2320_v23, %v2855_v52 }
  0x9b   : > { %1735 = vst.msk [vmem:[%s2519_s19 + $0x60] sm:$0xff] %vm1722_vm4, %v1702_v43  ;;  %v624_v34 = vrot.slane %v2925_v54, 7  ;;  %v1632_v37 = vmul.f32 %v2483_v7, %v1593_v55  ;;  %v1261_v29 = vadd.f32 %v1229_v4, %v1193_v22  ;;  %v1058_v60 = vadd.f32 %v1026_v40, %v990_v42  ;;  %v2979_v55 = vld [vmem:[%s3498_s4] ss:$0 sm:$0xff] }
  0x9c   : > { %v642_v53 = vrot.slane %v2939_v18, 7  ;;  %2051 = verf.f32 %v1499_v31  ;;  %v2951_v49 = vmul.f32 %v2231_v25, %v787_v57  ;;  %v1230_v36 = vmul.f32 %v2323_v24, %v2794_v14 }
  0x9d   : > { %v855_v59 = vmul.f32 %v2235_v27, %v2806_v0  ;;  %v1671_v3 = vadd.f32 %v2498_v56, %v1632_v37  ;;  %v1329_v13 = vadd.f32 %v1297_v26, %v1261_v29  ;;  %v1126_v15 = vadd.f32 %v1094_v33, %v1058_v60 }
  0x9e   : > { %v679_v4 = vsel %vm649_vm1, %v642_v53, %v624_v34  ;;  %v1298_v45 = vmul.f32 %v2329_v35, %v2865_v8  ;;  %v733_v19 = vrot.slane %v2925_v54, 1  ;;  %v891_v14 = vmul.f32 %v2277_v47, %v2884_v63 }
  0x9f   : > { %v2963_v39 = vmul.f32 %v3515_v6, %v679_v4  ;;  %v1703_v2 = vadd.f32 %v1671_v3, %v2629_v38  ;;  %v1397_v26 = vadd.f32 %v1365_v58, %v1329_v13  ;;  %v1194_v46 = vadd.f32 %v1162_v61, %v1126_v15 }
  0xa0   : > { %v2050_v0 = vpop.eup %2049  ;;  %v751_v12 = vrot.slane %v2939_v18, 1  ;;  %v923_v11 = vadd.f32 %v891_v14, %v855_v59  ;;  %v1027_v43 = vmul.f32 %v2285_v50, %v2776_v17  ;;  %v1467_v57 = vmul.f32 0.5, %v1435_v62 }
  0xa1   : > { %v1562_v32 = vadd.f32 1.0, %v2050_v0  ;;  %v959_v40 = vmul.f32 %v2280_v48, %v2963_v39  ;;  %1736 = vst.msk [vmem:[%s2519_s19 + $0x68] sm:$0xff] %vm1722_vm4, %v1703_v2  ;;  %v1436_v38 = vadd.f32 %v2979_v55, %v1397_v26  ;;  %v1262_v58 = vadd.f32 %v1230_v36, %v1194_v46  ;;  %v3014_v46 = vld [vmem:[%s2188_s29 + $0xb0] sm:$0xff] }
  0xa2   : > { %v1366_v22 = vmul.f32 %v2932_v9, %v2951_v49  ;;  %v2986_v33 = vsel %vm758_vm2, %v733_v19, %v751_v12  ;;  %v1095_v62 = vmul.f32 %v2288_v51, %v2852_v10  ;;  %v1163_v29 = vmul.f32 %v2320_v23, %v2925_v54 }
  0xa3   : > { %v1594_v42 = vmul.f32 %v1562_v32, %v1466_v21  ;;  %v991_v31 = vadd.f32 %v959_v40, %v923_v11  ;;  %v1500_v61 = vmul.f32 0.70710677, %v1436_v38  ;;  %v1330_v37 = vadd.f32 %v1298_v45, %v1262_v58  ;;  %v3017_v32 = vld [vmem:[%s2188_s29 + $0xb8] sm:$0xff] }
  0xa4   : > { %v1231_v60 = vmul.f32 %v2323_v24, %v2826_v16  ;;  %v2997_v21 = vsel %vm649_vm1, %v624_v34, %v642_v53  ;;  %v856_v3 = vmul.f32 %v2235_v27, %v2835_v30  ;;  %v892_v15 = vmul.f32 %v2277_v47, %v2913_v20 }
  0xa5   : > { %v1633_v36 = vmul.f32 %v2483_v7, %v1594_v42  ;;  %v1059_v59 = vadd.f32 %v1027_v43, %v991_v31  ;;  %2053 = verf.f32 %v1500_v61  ;;  %v1398_v13 = vadd.f32 %v1366_v22, %v1330_v37 }
  0xa6   : > { %v960_v16 = vmul.f32 %v2280_v48, %v2997_v21  ;;  %v2052_v4 = vpop.eup %2051  ;;  %v1299_v34 = vmul.f32 %v2329_v35, %v2900_v41  ;;  %v788_v53 = vsel %vm758_vm2, %v751_v12, %v733_v19  ;;  %v924_v2 = vadd.f32 %v892_v15, %v856_v3 }
  0xa7   : > { %v1672_v45 = vadd.f32 %v2498_v56, %v1633_v36  ;;  %v1127_v14 = vadd.f32 %v1095_v62, %v1059_v59  ;;  %v1563_v30 = vadd.f32 1.0, %v2052_v4  ;;  %v1437_v0 = vadd.f32 %v2979_v55, %v1398_v13 }
  0xa8   : > { %v1028_v26 = vmul.f32 %v2285_v50, %v2779_v44  ;;  %v1468_v40 = vmul.f32 0.5, %v1436_v38  ;;  %v1367_v58 = vmul.f32 %v2932_v9, %v2986_v33  ;;  %v992_v12 = vadd.f32 %v960_v16, %v924_v2 }
  0xa9   : > { %v1704_v11 = vadd.f32 %v1672_v45, %v2699_v28  ;;  %v1195_v43 = vadd.f32 %v1163_v29, %v1127_v14  ;;  %v1595_v22 = vmul.f32 %v1563_v30, %v1467_v57  ;;  %v1501_v19 = vmul.f32 0.70710677, %v1437_v0 }
  0xaa   : > { %v1096_v42 = vmul.f32 %v2288_v51, %v2855_v52  ;;  %v3027_v62 = vmul.f32 %v2231_v25, %v788_v53  ;;  %v625_v61 = vrot.slane %v3014_v46, 7  ;;  %v643_v28 = vrot.slane %v3017_v32, 7 }
  0xab   : > { %1737 = vst.msk [vmem:[%s2519_s19 + $0x70] sm:$0xff] %vm1722_vm4, %v1704_v11  ;;  %v1263_v31 = vadd.f32 %v1231_v60, %v1195_v43  ;;  %v1634_v38 = vmul.f32 %v2483_v7, %v1595_v22  ;;  %2055 = verf.f32 %v1501_v19  ;;  %v1060_v37 = vadd.f32 %v1028_v26, %v992_v12 }
  0xac   : > { %v1164_v57 = vmul.f32 %v2320_v23, %v2939_v18  ;;  %v1232_v36 = vmul.f32 %v2323_v24, %v2865_v8  ;;  %v680_v60 = vsel %vm649_vm1, %v643_v28, %v625_v61  ;;  %v857_v59 = vmul.f32 %v2235_v27, %v2884_v63 }
  0xad   : > { %v1331_v29 = vadd.f32 %v1299_v34, %v1263_v31  ;;  %v1673_v3 = vadd.f32 %v2498_v56, %v1634_v38  ;;  %v1128_v13 = vadd.f32 %v1096_v42, %v1060_v37  ;;  %v3042_v7 = vmul.f32 %v3515_v6, %v680_v60 }
  0xae   : > { %v893_v15 = vmul.f32 %v2277_v47, %v2963_v39  ;;  %v1469_v16 = vmul.f32 0.5, %v1437_v0  ;;  %v1300_v8 = vmul.f32 %v2329_v35, %v2951_v49  ;;  %v1029_v45 = vmul.f32 %v2285_v50, %v2852_v10 }
  0xaf   : > { %v1399_v4 = vadd.f32 %v1367_v58, %v1331_v29  ;;  %v2054_v14 = vpop.eup %2053  ;;  %v1705_v63 = vadd.f32 %v1673_v3, %v2702_v5  ;;  %v1196_v56 = vadd.f32 %v1164_v57, %v1128_v13  ;;  %v961_v53 = vmul.f32 %v2280_v48, %v3042_v7 }
  0xb0   : > { %v925_v34 = vadd.f32 %v893_v15, %v857_v59  ;;  %v1564_v30 = vadd.f32 1.0, %v2054_v14  ;;  %v734_v0 = vrot.slane %v3014_v46, 1  ;;  %v752_v26 = vrot.slane %v3017_v32, 1  ;;  %v3091_v15 = vld [vmem:[%s3500_s6] ss:$0 sm:$0xff] }
  0xb1   : > { %v1438_v2 = vadd.f32 %v2979_v55, %v1399_v4  ;;  %1738 = vst.msk [vmem:[%s2519_s19 + $0x78] sm:$0xff] %vm1722_vm4, %v1705_v63  ;;  %v1264_v11 = vadd.f32 %v1232_v36, %v1196_v56  ;;  %v1368_v43 = vmul.f32 %v2932_v9, %v3027_v62  ;;  %v1097_v5 = vmul.f32 %v2288_v51, %v2925_v54 }
  0xb2   : > { %v993_v58 = vadd.f32 %v961_v53, %v925_v34  ;;  %v1596_v22 = vmul.f32 %v1564_v30, %v1468_v40  ;;  %v3064_v12 = vsel %vm758_vm2, %v734_v0, %v752_v26  ;;  %v1165_v42 = vmul.f32 %v2320_v23, %v3014_v46  ;;  %v3075_v40 = vld [vmem:[%s3499_s5] ss:$0 sm:$0xff]  ;;  %v3105_v53 = vld [vmem:[%s2188_s29 + $0xc8] sm:$0xff] }
  0xb3   : > { %v1502_v19 = vmul.f32 0.70710677, %v1438_v2  ;;  %v1332_v31 = vadd.f32 %v1300_v8, %v1264_v11  ;;  %v1233_v37 = vmul.f32 %v2323_v24, %v2900_v41  ;;  %v858_v57 = vmul.f32 %v2235_v27, %v2913_v20  ;;  %v3102_v34 = vld [vmem:[%s2188_s29 + $0xc0] sm:$0xff] }
  0xb4   : > { %v1061_v38 = vadd.f32 %v1029_v45, %v993_v58  ;;  %v1635_v29 = vmul.f32 %v3075_v40, %v1596_v22  ;;  %v3080_v36 = vsel %vm649_vm1, %v625_v61, %v643_v28  ;;  %v894_v60 = vmul.f32 %v2277_v47, %v2997_v21 }
  0xb5   : > { %2057 = verf.f32 %v1502_v19  ;;  %v2056_v41 = vpop.eup %2055  ;;  %v1400_v59 = vadd.f32 %v1368_v43, %v1332_v31  ;;  %v1301_v3 = vmul.f32 %v2329_v35, %v2986_v33  ;;  %v962_v13 = vmul.f32 %v2280_v48, %v3080_v36 }
  0xb6   : > { %v1129_v20 = vadd.f32 %v1097_v5, %v1061_v38  ;;  %v1674_v61 = vadd.f32 %v3091_v15, %v1635_v29  ;;  %v1565_v28 = vadd.f32 1.0, %v2056_v41  ;;  %v926_v4 = vadd.f32 %v894_v60, %v858_v57 }
  0xb7   : > { %v1030_v8 = vmul.f32 %v2285_v50, %v2855_v52  ;;  %v1439_v45 = vadd.f32 %v2979_v55, %v1400_v59  ;;  %v1369_v63 = vmul.f32 %v2932_v9, %v3064_v12  ;;  %v789_v56 = vsel %vm758_vm2, %v752_v26, %v734_v0 }
  0xb8   : > { %v1197_v14 = vadd.f32 %v1165_v42, %v1129_v20  ;;  %v1706_v30 = vadd.f32 %v1674_v61, %v2776_v17  ;;  %v1597_v11 = vmul.f32 %v1565_v28, %v1469_v16  ;;  %v994_v43 = vadd.f32 %v962_v13, %v926_v4 }
  0xb9   : > { %v1098_v58 = vmul.f32 %v2288_v51, %v2939_v18  ;;  %v1470_v5 = vmul.f32 0.5, %v1438_v2  ;;  %v1503_v22 = vmul.f32 0.70710677, %v1439_v45  ;;  %v1166_v42 = vmul.f32 %v2320_v23, %v3017_v32 }
  0xba   : > { %v1265_v19 = vadd.f32 %v1233_v37, %v1197_v14  ;;  %1739 = vst.msk [vmem:[%s2519_s19 + $0x80] sm:$0xff] %vm1722_vm4, %v1706_v30  ;;  %v1636_v0 = vmul.f32 %v3075_v40, %v1597_v11  ;;  %v1062_v26 = vadd.f32 %v1030_v8, %v994_v43  ;;  %v626_v31 = vrot.slane %v3102_v34, 7 }
  0xbb   : > { %v644_v17 = vrot.slane %v3105_v53, 7  ;;  %2059 = verf.f32 %v1503_v22  ;;  %v3118_v38 = vmul.f32 %v2231_v25, %v789_v56  ;;  %v1234_v2 = vmul.f32 %v2323_v24, %v2951_v49 }
  0xbc   : > { %v1333_v16 = vadd.f32 %v1301_v3, %v1265_v19  ;;  %v1675_v37 = vadd.f32 %v3091_v15, %v1636_v0  ;;  %v1130_v57 = vadd.f32 %v1098_v58, %v1062_v26  ;;  %v859_v60 = vmul.f32 %v2235_v27, %v2963_v39 }
  0xbd   : > { %v681_v29 = vsel %vm649_vm1, %v644_v17, %v626_v31  ;;  %v1302_v59 = vmul.f32 %v2329_v35, %v3027_v62  ;;  %v895_v49 = vmul.f32 %v2277_v47, %v3042_v7  ;;  %v1471_v61 = vmul.f32 0.5, %v1439_v45 }
  0xbe   : > { %v1401_v41 = vadd.f32 %v1369_v63, %v1333_v16  ;;  %v3130_v20 = vmul.f32 %v3515_v6, %v681_v29  ;;  %v1707_v13 = vadd.f32 %v1675_v37, %v2779_v44  ;;  %v1198_v28 = vadd.f32 %v1166_v42, %v1130_v57 }
  0xbf   : > { %v2058_v3 = vpop.eup %2057  ;;  %v1031_v4 = vmul.f32 %v2285_v50, %v2925_v54  ;;  %v927_v14 = vadd.f32 %v895_v49, %v859_v60  ;;  %v1370_v30 = vmul.f32 %v2932_v9, %v3118_v38  ;;  %v735_v44 = vrot.slane %v3102_v34, 1 }
  0xc0   : > { %v1566_v8 = vadd.f32 1.0, %v2058_v3  ;;  %v1440_v39 = vadd.f32 %v2979_v55, %v1401_v41  ;;  %v963_v63 = vmul.f32 %v2280_v48, %v3130_v20  ;;  %1740 = vst.msk [vmem:[%s2519_s19 + $0x88] sm:$0xff] %vm1722_vm4, %v1707_v13  ;;  %v1266_v56 = vadd.f32 %v1234_v2, %v1198_v28  ;;  %v3176_v28 = vld [vmem:[%s2188_s29 + $0xd0] sm:$0xff] }
  0xc1   : > { %v753_v45 = vrot.slane %v3105_v53, 1  ;;  %v1099_v22 = vmul.f32 %v2288_v51, %v3014_v46  ;;  %v1167_v0 = vmul.f32 %v2320_v23, %v3102_v34  ;;  %v1235_v26 = vmul.f32 %v2323_v24, %v2986_v33 }
  0xc2   : > { %v1598_v11 = vmul.f32 %v1566_v8, %v1470_v5  ;;  %v1504_v43 = vmul.f32 0.70710677, %v1440_v39  ;;  %v995_v58 = vadd.f32 %v963_v63, %v927_v14  ;;  %v1334_v19 = vadd.f32 %v1302_v59, %v1266_v56 }
  0xc3   : > { %v3150_v42 = vsel %vm758_vm2, %v735_v44, %v753_v45  ;;  %v3159_v2 = vsel %vm649_vm1, %v626_v31, %v644_v17  ;;  %v860_v57 = vmul.f32 %v2235_v27, %v2997_v21  ;;  %v896_v29 = vmul.f32 %v2277_v47, %v3080_v36 }
  0xc4   : > { %v1637_v16 = vmul.f32 %v3075_v40, %v1598_v11  ;;  %2061 = verf.f32 %v1504_v43  ;;  %v1063_v5 = vadd.f32 %v1031_v4, %v995_v58  ;;  %v1402_v37 = vadd.f32 %v1370_v30, %v1334_v19  ;;  %v3179_v4 = vld [vmem:[%s2188_s29 + $0xd8] sm:$0xff] }
  0xc5   : > { %v964_v33 = vmul.f32 %v2280_v48, %v3159_v2  ;;  %v2060_v60 = vpop.eup %2059  ;;  %v1303_v49 = vmul.f32 %v2329_v35, %v3064_v12  ;;  %v790_v31 = vsel %vm758_vm2, %v753_v45, %v735_v44  ;;  %v928_v3 = vadd.f32 %v896_v29, %v860_v57 }
  0xc6   : > { %v1676_v41 = vadd.f32 %v3091_v15, %v1637_v16  ;;  %v1131_v59 = vadd.f32 %v1099_v22, %v1063_v5  ;;  %v1567_v17 = vadd.f32 1.0, %v2060_v60  ;;  %v1441_v21 = vadd.f32 %v2979_v55, %v1402_v37 }
  0xc7   : > { %v1032_v13 = vmul.f32 %v2285_v50, %v2939_v18  ;;  %v1472_v14 = vmul.f32 0.5, %v1440_v39  ;;  %v1371_v56 = vmul.f32 %v2932_v9, %v3150_v42  ;;  %v996_v45 = vadd.f32 %v964_v33, %v928_v3 }
  0xc8   : > { %v1708_v8 = vadd.f32 %v1676_v41, %v2852_v10  ;;  %v1199_v63 = vadd.f32 %v1167_v0, %v1131_v59  ;;  %v1599_v30 = vmul.f32 %v1567_v17, %v1471_v61  ;;  %v1505_v44 = vmul.f32 0.70710677, %v1441_v21 }
  0xc9   : > { %v1100_v11 = vmul.f32 %v2288_v51, %v3017_v32  ;;  %v3189_v58 = vmul.f32 %v2231_v25, %v790_v31  ;;  %v627_v22 = vrot.slane %v3176_v28, 7  ;;  %v645_v10 = vrot.slane %v3179_v4, 7 }
  0xca   : > { %1741 = vst.msk [vmem:[%s2519_s19 + $0x90] sm:$0xff] %vm1722_vm4, %v1708_v8  ;;  %v1267_v43 = vadd.f32 %v1235_v26, %v1199_v63  ;;  %v1638_v39 = vmul.f32 %v3075_v40, %v1599_v30  ;;  %2063 = verf.f32 %v1505_v44  ;;  %v1064_v19 = vadd.f32 %v1032_v13, %v996_v45 }
  0xcb   : > { %v1168_v61 = vmul.f32 %v2320_v23, %v3105_v53  ;;  %v1236_v16 = vmul.f32 %v2323_v24, %v3027_v62  ;;  %v682_v26 = vsel %vm649_vm1, %v645_v10, %v627_v22  ;;  %v861_v5 = vmul.f32 %v2235_v27, %v3042_v7 }
  0xcc   : > { %v1335_v0 = vadd.f32 %v1303_v49, %v1267_v43  ;;  %v1677_v37 = vadd.f32 %v3091_v15, %v1638_v39  ;;  %v1132_v57 = vadd.f32 %v1100_v11, %v1064_v19  ;;  %v1304_v29 = vmul.f32 %v2329_v35, %v3118_v38 }
  0xcd   : > { %v897_v33 = vmul.f32 %v2277_v47, %v3130_v20  ;;  %v3208_v62 = vmul.f32 %v3515_v6, %v682_v26  ;;  %v736_v59 = vrot.slane %v3176_v28, 1  ;;  %v754_v49 = vrot.slane %v3179_v4, 1 }
  0xce   : > { %v2062_v60 = vpop.eup %2061  ;;  %v1403_v41 = vadd.f32 %v1371_v56, %v1335_v0  ;;  %v1709_v7 = vadd.f32 %v1677_v37, %v2855_v52  ;;  %v1200_v17 = vadd.f32 %v1168_v61, %v1132_v57  ;;  %v1473_v13 = vmul.f32 0.5, %v1441_v21 }
  0xcf   : > { %v1568_v31 = vadd.f32 1.0, %v2062_v60  ;;  %v929_v3 = vadd.f32 %v897_v33, %v861_v5  ;;  %v965_v63 = vmul.f32 %v2280_v48, %v3208_v62  ;;  %v1033_v56 = vmul.f32 %v2285_v50, %v3014_v46 }
  0xd0   : > { %v1442_v8 = vadd.f32 %v2979_v55, %v1403_v41  ;;  %1742 = vst.msk [vmem:[%s2519_s19 + $0x98] sm:$0xff] %vm1722_vm4, %v1709_v7  ;;  %v1268_v44 = vadd.f32 %v1236_v16, %v1200_v17  ;;  %v1372_v45 = vmul.f32 %v2932_v9, %v3189_v58  ;;  %v3224_v52 = vsel %vm758_vm2, %v736_v59, %v754_v49 }
  0xd1   : > { %v1600_v30 = vmul.f32 %v1568_v31, %v1472_v14  ;;  %v997_v11 = vadd.f32 %v965_v63, %v929_v3  ;;  %v1101_v43 = vmul.f32 %v2288_v51, %v3102_v34  ;;  %v1169_v39 = vmul.f32 %v2320_v23, %v3176_v28  ;;  %v3258_v63 = vld [vmem:[%s2188_s29 + $0xe8] sm:$0xff] }
  0xd2   : > { %v1506_v21 = vmul.f32 0.70710677, %v1442_v8  ;;  %v1336_v61 = vadd.f32 %v1304_v29, %v1268_v44  ;;  %v1237_v14 = vmul.f32 %v2323_v24, %v3064_v12  ;;  %v862_v0 = vmul.f32 %v2235_v27, %v3080_v36 }
  0xd3   : > { %v1639_v19 = vmul.f32 %v3075_v40, %v1600_v30  ;;  %v1065_v16 = vadd.f32 %v1033_v56, %v997_v11  ;;  %v3237_v26 = vsel %vm649_vm1, %v627_v22, %v645_v10  ;;  %v898_v5 = vmul.f32 %v2277_v47, %v3159_v2  ;;  %v3249_v10 = vld [vmem:[%s2188_s29 + $0xe0] sm:$0xff] }
  0xd4   : > { %2065 = verf.f32 %v1506_v21  ;;  %v2064_v37 = vpop.eup %2063  ;;  %v1404_v29 = vadd.f32 %v1372_v45, %v1336_v61  ;;  %v1305_v12 = vmul.f32 %v2329_v35, %v3150_v42  ;;  %v966_v36 = vmul.f32 %v2280_v48, %v3237_v26 }
  0xd5   : > { %v1678_v57 = vadd.f32 %v3091_v15, %v1639_v19  ;;  %v1569_v33 = vadd.f32 1.0, %v2064_v37  ;;  %v1133_v60 = vadd.f32 %v1101_v43, %v1065_v16  ;;  %v930_v41 = vadd.f32 %v898_v5, %v862_v0 }
  0xd6   : > { %v1034_v22 = vmul.f32 %v2285_v50, %v3017_v32  ;;  %v1443_v31 = vadd.f32 %v2979_v55, %v1404_v29  ;;  %v1373_v17 = vmul.f32 %v2932_v9, %v3224_v52  ;;  %v791_v3 = vsel %vm758_vm2, %v754_v49, %v736_v59 }
  0xd7   : > { %v1710_v7 = vadd.f32 %v1678_v57, %v2925_v54  ;;  %v1601_v56 = vmul.f32 %v1569_v33, %v1473_v13  ;;  %v1201_v30 = vadd.f32 %v1169_v39, %v1133_v60  ;;  %v998_v44 = vadd.f32 %v966_v36, %v930_v41 }
  0xd8   : > { %v1102_v45 = vmul.f32 %v2288_v51, %v3105_v53  ;;  %v1474_v21 = vmul.f32 0.5, %v1442_v8  ;;  %v1507_v54 = vmul.f32 0.70710677, %v1443_v31  ;;  %v1170_v11 = vmul.f32 %v2320_v23, %v3179_v4 }
  0xd9   : > { %1743 = vst.msk [vmem:[%s2519_s19 + $0xa0] sm:$0xff] %vm1722_vm4, %v1710_v7  ;;  %v628_v43 = vrot.slane %v3249_v10, 7  ;;  %v1640_v19 = vmul.f32 %v3075_v40, %v1601_v56  ;;  %v1269_v59 = vadd.f32 %v1237_v14, %v1201_v30  ;;  %v1066_v49 = vadd.f32 %v1034_v22, %v998_v44 }
  0xda   : > { %v646_v13 = vrot.slane %v3258_v63, 7  ;;  %2067 = verf.f32 %v1507_v54  ;;  %v3270_v39 = vmul.f32 %v2231_v25, %v791_v3  ;;  %v1238_v61 = vmul.f32 %v2323_v24, %v3118_v38 }
  0xdb   : > { %v863_v8 = vmul.f32 %v2235_v27, %v3130_v20  ;;  %v1679_v0 = vadd.f32 %v3091_v15, %v1640_v19  ;;  %v1337_v16 = vadd.f32 %v1305_v12, %v1269_v59  ;;  %v1134_v5 = vadd.f32 %v1102_v45, %v1066_v49 }
  0xdc   : > { %v683_v14 = vsel %vm649_vm1, %v646_v13, %v628_v43  ;;  %v1306_v37 = vmul.f32 %v2329_v35, %v3189_v58  ;;  %v737_v29 = vrot.slane %v3249_v10, 1  ;;  %v899_v38 = vmul.f32 %v2277_v47, %v3208_v62 }
  0xdd   : > { %v3282_v57 = vmul.f32 %v3515_v6, %v683_v14  ;;  %v1711_v36 = vadd.f32 %v1679_v0, %v2939_v18  ;;  %v1405_v12 = vadd.f32 %v1373_v17, %v1337_v16  ;;  %v1202_v33 = vadd.f32 %v1170_v11, %v1134_v5 }
  0xde   : > { %v2066_v20 = vpop.eup %2065  ;;  %v755_v60 = vrot.slane %v3258_v63, 1  ;;  %v931_v22 = vadd.f32 %v899_v38, %v863_v8  ;;  %v1035_v3 = vmul.f32 %v2285_v50, %v3102_v34  ;;  %v1475_v56 = vmul.f32 0.5, %v1443_v31 }
  0xdf   : > { %v1570_v41 = vadd.f32 1.0, %v2066_v20  ;;  %v967_v7 = vmul.f32 %v2280_v48, %v3282_v57  ;;  %1744 = vst.msk [vmem:[%s2519_s19 + $0xa8] sm:$0xff] %vm1722_vm4, %v1711_v36  ;;  %v1444_v30 = vadd.f32 %v2979_v55, %v1405_v12  ;;  %v1270_v44 = vadd.f32 %v1238_v61, %v1202_v33  ;;  %v3328_v33 = vld [vmem:[%s2188_s29 + $0xf0] sm:$0xff] }
  0xe0   : > { %v1374_v18 = vmul.f32 %v2932_v9, %v3270_v39  ;;  %v3300_v45 = vsel %vm758_vm2, %v737_v29, %v755_v60  ;;  %v1103_v11 = vmul.f32 %v2288_v51, %v3176_v28  ;;  %v1171_v31 = vmul.f32 %v2320_v23, %v3249_v10 }
  0xe1   : > { %v1602_v17 = vmul.f32 %v1570_v41, %v1474_v21  ;;  %v999_v54 = vadd.f32 %v967_v7, %v931_v22  ;;  %v1508_v19 = vmul.f32 0.70710677, %v1444_v30  ;;  %v1338_v59 = vadd.f32 %v1306_v37, %v1270_v44  ;;  %v3331_v41 = vld [vmem:[%s2188_s29 + $0xf8] sm:$0xff] }
  0xe2   : > { %v1239_v49 = vmul.f32 %v2323_v24, %v3150_v42  ;;  %v3311_v21 = vsel %vm649_vm1, %v628_v43, %v646_v13  ;;  %v864_v0 = vmul.f32 %v2235_v27, %v3159_v2  ;;  %v900_v5 = vmul.f32 %v2277_v47, %v3237_v26 }
  0xe3   : > { %v1641_v61 = vmul.f32 %v3075_v40, %v1602_v17  ;;  %v1067_v8 = vadd.f32 %v1035_v3, %v999_v54  ;;  %2069 = verf.f32 %v1508_v19  ;;  %v1406_v16 = vadd.f32 %v1374_v18, %v1338_v59 }
  0xe4   : > { %v968_v42 = vmul.f32 %v2280_v48, %v3311_v21  ;;  %v2068_v14 = vpop.eup %2067  ;;  %v1307_v43 = vmul.f32 %v2329_v35, %v3224_v52  ;;  %v792_v13 = vsel %vm758_vm2, %v755_v60, %v737_v29  ;;  %v932_v36 = vadd.f32 %v900_v5, %v864_v0 }
  0xe5   : > { %v1680_v37 = vadd.f32 %v3091_v15, %v1641_v61  ;;  %v1135_v38 = vadd.f32 %v1103_v11, %v1067_v8  ;;  %v1571_v2 = vadd.f32 1.0, %v2068_v14  ;;  %v1445_v20 = vadd.f32 %v2979_v55, %v1406_v16 }
  0xe6   : > { %v1036_v12 = vmul.f32 %v2285_v50, %v3105_v53  ;;  %v1476_v7 = vmul.f32 0.5, %v1444_v30  ;;  %v1375_v44 = vmul.f32 %v2932_v9, %v3300_v45  ;;  %v1000_v60 = vadd.f32 %v968_v42, %v932_v36 }
  0xe7   : > { %v1712_v22 = vadd.f32 %v1680_v37, %v3014_v46  ;;  %v1203_v3 = vadd.f32 %v1171_v31, %v1135_v38  ;;  %v1603_v18 = vmul.f32 %v1571_v2, %v1475_v56  ;;  %v1509_v29 = vmul.f32 0.70710677, %v1445_v20 }
  0xe8   : > { %v1104_v17 = vmul.f32 %v2288_v51, %v3179_v4  ;;  %v3341_v11 = vmul.f32 %v2231_v25, %v792_v13  ;;  %v629_v19 = vrot.slane %v3328_v33, 7  ;;  %v647_v46 = vrot.slane %v3331_v41, 7 }
  0xe9   : > { %1745 = vst.msk [vmem:[%s2519_s19 + $0xb0] sm:$0xff] %vm1722_vm4, %v1712_v22  ;;  %v1271_v54 = vadd.f32 %v1239_v49, %v1203_v3  ;;  %v1642_v30 = vmul.f32 %v3075_v40, %v1603_v18  ;;  %2071 = verf.f32 %v1509_v29  ;;  %v1068_v59 = vadd.f32 %v1036_v12, %v1000_v60 }
  0xea   : > { %v1172_v56 = vmul.f32 %v2320_v23, %v3258_v63  ;;  %v1240_v61 = vmul.f32 %v2323_v24, %v3189_v58  ;;  %v684_v49 = vsel %vm649_vm1, %v647_v46, %v629_v19  ;;  %v865_v8 = vmul.f32 %v2235_v27, %v3208_v62 }
  0xeb   : > { %v1339_v31 = vadd.f32 %v1307_v43, %v1271_v54  ;;  %v1681_v0 = vadd.f32 %v3091_v15, %v1642_v30  ;;  %v1136_v16 = vadd.f32 %v1104_v17, %v1068_v59  ;;  %v718_v5 = vmul.f32 %v3515_v6, %v684_v49 }
  0xec   : > { %v901_v42 = vmul.f32 %v2277_v47, %v3282_v57  ;;  %v1477_v14 = vmul.f32 0.5, %v1445_v20  ;;  %v1308_v58 = vmul.f32 %v2329_v35, %v3270_v39  ;;  %v1037_v38 = vmul.f32 %v2285_v50, %v3176_v28 }
  0xed   : > { %v1407_v37 = vadd.f32 %v1375_v44, %v1339_v31  ;;  %v2070_v43 = vpop.eup %2069  ;;  %v1713_v62 = vadd.f32 %v1681_v0, %v3017_v32  ;;  %v1204_v13 = vadd.f32 %v1172_v56, %v1136_v16  ;;  %v969_v36 = vmul.f32 %v2280_v48, %v718_v5 }
  0xee   : > { %v933_v2 = vadd.f32 %v901_v42, %v865_v8  ;;  %v1572_v12 = vadd.f32 1.0, %v2070_v43  ;;  %v738_v22 = vrot.slane %v3328_v33, 1  ;;  %v756_v20 = vrot.slane %v3331_v41, 1 }
  0xef   : > { %v1446_v6 = vadd.f32 %v2979_v55, %v1407_v37  ;;  %1746 = vst.msk [vmem:[%s2519_s19 + $0xb8] sm:$0xff] %vm1722_vm4, %v1713_v62  ;;  %v1272_v3 = vadd.f32 %v1240_v61, %v1204_v13  ;;  %v1376_v44 = vmul.f32 %v2932_v9, %v3341_v11  ;;  %v1105_v32 = vmul.f32 %v2288_v51, %v3249_v10 }
  0xf0   : > { %v1001_v18 = vadd.f32 %v969_v36, %v933_v2  ;;  %v1604_v29 = vmul.f32 %v1572_v12, %v1476_v7  ;;  %v3375_v17 = vsel %vm758_vm2, %v738_v22, %v756_v20  ;;  %v1173_v54 = vmul.f32 %v2320_v23, %v3328_v33 }
  0xf1   : > { %v1510_v60 = vmul.f32 0.70710677, %v1446_v6  ;;  %v1340_v30 = vadd.f32 %v1308_v58, %v1272_v3  ;;  %v1241_v56 = vmul.f32 %v2323_v24, %v3224_v52  ;;  %v866_v31 = vmul.f32 %v2235_v27, %v3237_v26 }
  0xf2   : > { %v1069_v59 = vadd.f32 %v1037_v38, %v1001_v18  ;;  %v1643_v61 = vmul.f32 %v3075_v40, %v1604_v29  ;;  %v666_v7 = vsel %vm649_vm1, %v629_v19, %v647_v46  ;;  %v902_v49 = vmul.f32 %v2277_v47, %v3311_v21 }
  0xf3   : > { %2073 = verf.f32 %v1510_v60  ;;  %v2072_v8 = vpop.eup %2071  ;;  %v1408_v0 = vadd.f32 %v1376_v44, %v1340_v30  ;;  %v793_v42 = vsel %vm758_vm2, %v756_v20, %v738_v22  ;;  %v970_v52 = vmul.f32 %v2280_v48, %v666_v7 }
  0xf4   : > { %v1137_v16 = vadd.f32 %v1105_v32, %v1069_v59  ;;  %v1682_v37 = vadd.f32 %v3091_v15, %v1643_v61  ;;  %v1573_v26 = vadd.f32 1.0, %v2072_v8  ;;  %v934_v58 = vadd.f32 %v902_v49, %v866_v31 }
  0xf5   : > { %v1038_v38 = vmul.f32 %v2285_v50, %v3179_v4  ;;  %v1447_v19 = vadd.f32 %v2979_v55, %v1408_v0  ;;  %v1309_v43 = vmul.f32 %v2329_v35, %v3300_v45  ;;  %v1377_v1 = vmul.f32 %v2932_v9, %v3375_v17 }
  0xf6   : > { %v1205_v46 = vadd.f32 %v1173_v54, %v1137_v16  ;;  %v1714_v62 = vadd.f32 %v1682_v37, %v3102_v34  ;;  %v1605_v13 = vmul.f32 %v1573_v26, %v1477_v14  ;;  %v1002_v2 = vadd.f32 %v970_v52, %v934_v58 }
  0xf7   : > { %v1106_v36 = vmul.f32 %v2288_v51, %v3258_v63  ;;  %v1511_v12 = vmul.f32 0.70710677, %v1447_v19  ;;  %v3403_v20 = vmul.f32 %v2231_v25, %v793_v42  ;;  %v1174_v3 = vmul.f32 %v2320_v23, %v3331_v41  ;;  %v3517_v25 = vld [vmem:[#allocation6_spill] sm:$0xff] }
  0xf8   : > { %v1273_v22 = vadd.f32 %v1241_v56, %v1205_v46  ;;  %1747 = vst.msk [vmem:[%s2519_s19 + $0xc0] sm:$0xff] %vm1722_vm4, %v1714_v62  ;;  %v1644_v44 = vmul.f32 %v3075_v40, %v1605_v13  ;;  %v1070_v18 = vadd.f32 %v1038_v38, %v1002_v2  ;;  %v867_v34 = vmul.f32 %v2235_v27, %v3282_v57 }
  0xf9   : > { %v903_v14 = vmul.f32 %v2277_v47, %v718_v5  ;;  %2075 = verf.f32 %v1511_v12  ;;  %v1242_v29 = vmul.f32 %v2323_v24, %v3270_v39  ;;  %v971_v60 = vmul.f32 %v2280_v48, %v3517_v25 }
  0xfa   : > { %v1341_v32 = vadd.f32 %v1309_v43, %v1273_v22  ;;  %v1683_v54 = vadd.f32 %v3091_v15, %v1644_v44  ;;  %v1138_v30 = vadd.f32 %v1106_v36, %v1070_v18  ;;  %v1039_v56 = vmul.f32 %v2285_v50, %v3249_v10 }
  0xfb   : > { %v935_v59 = vadd.f32 %v903_v14, %v867_v34  ;;  %v1478_v31 = vmul.f32 0.5, %v1446_v6  ;;  %v1310_v5 = vmul.f32 %v2329_v35, %v3341_v11  ;;  %v1378_v61 = vmul.f32 %v2932_v9, %v3403_v20  ;;  %v3519_v14 = vld [vmem:[#allocation3_spill] sm:$0xff] }
  0xfc   : > { %v1409_v57 = vadd.f32 %v1377_v1, %v1341_v32  ;;  %v1715_v49 = vadd.f32 %v1683_v54, %v3105_v53  ;;  %v1206_v8 = vadd.f32 %v1174_v3, %v1138_v30  ;;  %v1107_v16 = vmul.f32 %v2288_v51, %v3328_v33  ;;  %v3518_v53 = vld [vmem:[#allocation2_spill] sm:$0xff] }
  0xfd   : > { %v2074_v39 = vpop.eup %2073  ;;  %v1003_v0 = vadd.f32 %v971_v60, %v935_v59  ;;  %v868_v6 = vmul.f32 %v2235_v27, %v3311_v21  ;;  %v904_v37 = vmul.f32 %v2277_v47, %v666_v7  ;;  %v1175_v38 = vmul.f32 0.0, %v2320_v23 }
  0xfe   : > { %v1574_v42 = vadd.f32 1.0, %v2074_v39  ;;  %v1448_v52 = vadd.f32 %v2979_v55, %v1409_v57  ;;  %1748 = vst.msk [vmem:[%s2519_s19 + $0xc8] sm:$0xff] %vm1722_vm4, %v1715_v49  ;;  %v1274_v26 = vadd.f32 %v1242_v29, %v1206_v8  ;;  %v972_v46 = vmul.f32 %v2280_v48, %v3518_v53 }
  0xff   : > { %v1071_v58 = vadd.f32 %v1039_v56, %v1003_v0  ;;  %v936_v62 = vadd.f32 %v904_v37, %v868_v6  ;;  %v1040_v13 = vmul.f32 %v2285_v50, %v3258_v63  ;;  %v1243_v27 = vmul.f32 %v2323_v24, %v3300_v45 }
 0x100   : > { %v1606_v43 = vmul.f32 %v1574_v42, %v1478_v31  ;;  %v1512_v1 = vmul.f32 0.70710677, %v1448_v52  ;;  %v1342_v2 = vadd.f32 %v1310_v5, %v1274_v26  ;;  %v1108_v23 = vmul.f32 %v2288_v51, %v3331_v41 }
 0x101   : > { %v1139_v36 = vadd.f32 %v1107_v16, %v1071_v58  ;;  %v1004_v21 = vadd.f32 %v972_v46, %v936_v62  ;;  %v1479_v7 = vmul.f32 0.5, %v1447_v19  ;;  %v1311_v22 = vmul.f32 %v2329_v35, %v3375_v17 }
 0x102   : > { %v1645_v47 = vmul.f32 %v3075_v40, %v1606_v43  ;;  %2077 = verf.f32 %v1512_v1  ;;  %v1410_v48 = vadd.f32 %v1378_v61, %v1342_v2  ;;  %v1379_v32 = vmul.f32 %v2932_v9, %v3519_v14 }
 0x103   : > { %v1207_v12 = vadd.f32 %v1175_v38, %v1139_v36  ;;  %v2076_v50 = vpop.eup %2075  ;;  %v1072_v44 = vadd.f32 %v1040_v13, %v1004_v21  ;;  %v1244_v29 = vmul.f32 %v2323_v24, %v3341_v11  ;;  %v1312_v30 = vmul.f32 %v2329_v35, %v3403_v20 }
 0x104   : > { %v1684_v3 = vadd.f32 %v3091_v15, %v1645_v47  ;;  %v1575_v18 = vadd.f32 1.0, %v2076_v50  ;;  %v1449_v45 = vadd.f32 %v2979_v55, %v1410_v48  ;;  %v1480_v11 = vmul.f32 0.5, %v1448_v52 }
 0x105   : > { %v1275_v34 = vadd.f32 %v1243_v27, %v1207_v12  ;;  %v1140_v19 = vadd.f32 %v1108_v23, %v1072_v44 }
 0x106   : > { %v1716_v51 = vadd.f32 %v1684_v3, %v3176_v28  ;;  %v1607_v25 = vmul.f32 %v1575_v18, %v1479_v7  ;;  %v1513_v60 = vmul.f32 0.70710677, %v1449_v45  ;;  %v3520_v28 = vld [vmem:[#allocation7_spill] sm:$0xff]  ;;  %v1481_v42 = vmul.f32 0.5, %v1449_v45 }
 0x107   : > { %v1343_v17 = vadd.f32 %v1311_v22, %v1275_v34  ;;  %v1208_v54 = vadd.f32 %v1175_v38, %v1140_v19  ;;  %v1380_v57 = vmul.f32 %v2932_v9, %v3520_v28 }
 0x108   : > { %1749 = vst.msk [vmem:[%s2519_s19 + $0xd0] sm:$0xff] %vm1722_vm4, %v1716_v51  ;;  %v1646_v59 = vmul.f32 %v3075_v40, %v1607_v25  ;;  %2079 = verf.f32 %v1513_v60 }
 0x109   : > { %v1411_v56 = vadd.f32 %v1379_v32, %v1343_v17  ;;  %v1276_v31 = vadd.f32 %v1244_v29, %v1208_v54 }
 0x10a   : > { %v1685_v24 = vadd.f32 %v3091_v15, %v1646_v59 }
 0x10b   : > { %v1450_v5 = vadd.f32 %v2979_v55, %v1411_v56  ;;  %v1344_v39 = vadd.f32 %v1312_v30, %v1276_v31 }
 0x10c   : > { %v2078_v61 = vpop.eup %2077  ;;  %v1717_v49 = vadd.f32 %v1685_v24, %v3179_v4 }
 0x10d   : > { %v1576_v8 = vadd.f32 1.0, %v2078_v61  ;;  %v1514_v35 = vmul.f32 0.70710677, %v1450_v5  ;;  %v1412_v20 = vadd.f32 %v1380_v57, %v1344_v39  ;;  %v1482_v53 = vmul.f32 0.5, %v1450_v5 }
 0x10e   : > { %1750 = vst.msk [vmem:[%s2519_s19 + $0xd8] sm:$0xff] %vm1722_vm4, %v1717_v49 }
 0x10f   : > { %v1608_v0 = vmul.f32 %v1576_v8, %v1480_v11  ;;  %2081 = verf.f32 %v1514_v35  ;;  %v1451_v16 = vadd.f32 %v2979_v55, %v1412_v20 }
 0x111   : > { %v1647_v9 = vmul.f32 %v3075_v40, %v1608_v0  ;;  %v1515_v52 = vmul.f32 0.70710677, %v1451_v16  ;;  %v1483_v13 = vmul.f32 0.5, %v1451_v16 }
 0x112   : > { %v2080_v6 = vpop.eup %2079 }
 0x113   : > { %v1686_v37 = vadd.f32 %v3091_v15, %v1647_v9  ;;  %v1577_v26 = vadd.f32 1.0, %v2080_v6  ;;  %2083 = verf.f32 %v1515_v52 }
 0x115   : > { %v1718_v4 = vadd.f32 %v1686_v37, %v3249_v10  ;;  %v1609_v58 = vmul.f32 %v1577_v26, %v1481_v42 }
 0x117   : > { %1751 = vst.msk [vmem:[%s2519_s19 + $0xe0] sm:$0xff] %vm1722_vm4, %v1718_v4  ;;  %v1648_v38 = vmul.f32 %v3075_v40, %v1609_v58 }
 0x119   : > { %v2082_v55 = vpop.eup %2081  ;;  %v1687_v46 = vadd.f32 %v3091_v15, %v1648_v38 }
 0x11a   : > { %v1578_v43 = vadd.f32 1.0, %v2082_v55 }
 0x11b   : > { %v1719_v1 = vadd.f32 %v1687_v46, %v3258_v63 }
 0x11c   : > { %v1610_v62 = vmul.f32 %v1578_v43, %v1482_v53 }
 0x11d   : > { %v2084_v2 = vpop.eup %2083  ;;  %1752 = vst.msk [vmem:[%s2519_s19 + $0xe8] sm:$0xff] %vm1722_vm4, %v1719_v1 }
 0x11e   : > { %v1649_v10 = vmul.f32 %v3075_v40, %v1610_v62  ;;  %v1579_v36 = vadd.f32 1.0, %v2084_v2 }
 0x120   : > { %v1688_v27 = vadd.f32 %v3091_v15, %v1649_v10  ;;  %v1611_v47 = vmul.f32 %v1579_v36, %v1483_v13 }
 0x122   : > { %v1720_v21 = vadd.f32 %v1688_v27, %v3328_v33  ;;  %v1650_v23 = vmul.f32 %v3075_v40, %v1611_v47 }
 0x124   : > { %1753 = vst.msk [vmem:[%s2519_s19 + $0xf0] sm:$0xff] %vm1722_vm4, %v1720_v21  ;;  %v1689_v7 = vadd.f32 %v3091_v15, %v1650_v23 }
 0x126   : > { %v1721_v63 = vadd.f32 %v1689_v7, %v3331_v41 }
 0x128   : > { %1754 = vst.msk [vmem:[%s2519_s19 + $0xf8] sm:$0xff] %vm1722_vm4, %v1721_v63 }
 0x129 PF: > { %s17_s2 = sadd.s32 1, %s2111_s2   ;;  %s3521_s24 = smov %s2107_s1 }
 0x12a   : > { %p14_p5 = scmp.ge.s32.totalorder %s17_s2, 4   ;;  %s3522_s1 = smov %s3524_s25 }
 0x12c   :  { %16 = sbr.rel (!%p14_p5) target bundleno = 2 (0x2), region = 96 }

</bundles_post_ra>
